<compile_context>
chip_gen: v7x
topology: tpu7x:2x2x1
jax: 0.10.0
libtpu: 0.0.40
codegen_flags: <defaults>
</compile_context>

<pallas_src>
import jax
import jax.numpy as jnp
from jax import lax
from jax.experimental import pallas as pl
from jax.experimental.pallas import tpu as pltpu


# ------------------------------ Pallas kernel -------------------------------

def _make_bottleneck_kernel(TH, W, Cin, Cw, Cout, n_r):
    """Builds the fused Bottleneck kernel for one (batch, row-block) step."""

    def kernel(x_ref, w1_ref, s1_ref, b1_ref, w2_ref, s2_ref, b2_ref,
               w3_ref, s3_ref, b3_ref, o_ref, y1_ref):
        # x_ref : (1, H, W, Cin)   bf16  full image (resident across row blocks)
        # w1_ref: (Cin, Cw)        bf16
        # w2_ref: (3, 3*Cw, Cw)    bf16  ky-grouped 3x3 taps; rows = kx*Cw + cin
        # w3_ref: (Cw, Cout)       bf16
        # s*/b* : (1, C)           f32   folded BatchNorm scale / bias
        # o_ref : (1, TH, W, Cout)
        # y1_ref: (TH+2, W, 3*Cw)  bf16  conv1 output, pre-shifted along W and
        #                                concatenated over kx (im2col columns)
        r = pl.program_id(1)
        row0 = r * TH

        w1 = w1_ref[...]
        s1 = s1_ref[...]
        b1 = b1_ref[...]

        def conv1_shifted(x4d):
            # (1, R, W, Cin) -> (R, W, 3*Cw): conv1 + bn1 + relu, then build the
            # three kx-shifted copies on register values (value-level slice +
            # concat) so the single scratch store stays lane/sublane aligned.
            R = x4d.shape[1]
            y = jnp.dot(x4d.reshape(R * W, Cin), w1,
                        preferred_element_type=jnp.float32)
            y = jnp.maximum(y * s1 + b1, 0.0)
            y = y.reshape(R, W, Cw).astype(jnp.bfloat16)
            zcol = jnp.zeros((R, 1, Cw), jnp.bfloat16)
            left = jnp.concatenate([zcol, y[:, :W - 1, :]], axis=1)   # y[., w-1]
            right = jnp.concatenate([y[:, 1:, :], zcol], axis=1)      # y[., w+1]
            return jnp.concatenate([left, y, right], axis=-1)

        # ---- stage 1: conv1 + bn1 + relu (one matmul over the TH rows) ----
        y1_ref[1:TH + 1] = conv1_shifted(x_ref[:, pl.ds(row0, TH), :, :])

        # Halo rows: zero at the image border, recomputed from the neighbour
        # row otherwise (the recompute path only exists when the image is
        # actually row-split, i.e. N == 1).
        zrow = jnp.zeros((1, W, 3 * Cw), jnp.bfloat16)
        if n_r == 1:
            y1_ref[0:1] = zrow
            y1_ref[TH + 1:TH + 2] = zrow
        else:
            @pl.when(r == 0)
            def _():
                y1_ref[0:1] = zrow

            @pl.when(r > 0)
            def _():
                y1_ref[0:1] = conv1_shifted(x_ref[:, pl.ds(row0 - 1, 1), :, :])

            @pl.when(r == n_r - 1)
            def _():
                y1_ref[TH + 1:TH + 2] = zrow

            @pl.when(r < n_r - 1)
            def _():
                y1_ref[TH + 1:TH + 2] = conv1_shifted(
                    x_ref[:, pl.ds(row0 + TH, 1), :, :])

        # ---- stage 2: 3x3 conv = 3 ky-grouped K=3*Cw matmuls, register acc ----
        acc = None
        for ky in range(3):                                  # static unroll
            patch = y1_ref[ky:ky + TH].reshape(TH * W, 3 * Cw)   # free slice
            contrib = jnp.dot(patch, w2_ref[ky],
                              preferred_element_type=jnp.float32)
            acc = contrib if acc is None else acc + contrib
        y2 = jnp.maximum(acc * s2_ref[...] + b2_ref[...], 0.0)
        y2 = y2.astype(jnp.bfloat16)

        # ---- stage 3: conv3 + bn3 + identity residual + relu ----
        y3 = jnp.dot(y2, w3_ref[...], preferred_element_type=jnp.float32)
        res = x_ref[:, pl.ds(row0, TH), :, :].reshape(TH * W, Cin)
        y3 = y3 * s3_ref[...] + b3_ref[...] + res.astype(jnp.float32)
        o_ref[...] = jnp.maximum(y3, 0.0).reshape(1, TH, W, Cout).astype(o_ref.dtype)

    return kernel


# ------------------------------ host wrapper --------------------------------

def _choose_row_tile(N, H, W, Cin, Cw, Cout, budget_bytes=24 << 20):
    """Row tile TH (a divisor of H).  Whole image per grid step unless the
    VMEM budget forces a split, or N == 1 (keep >= 2 grid steps so both v7x
    TensorCores get work; the extra step is cheap on v5e/v6e)."""
    def vmem_bytes(th):
        return (2 * H * W * Cin * 2                          # resident input (2x buf)
                + (th + 2) * W * 3 * Cw * 2                  # shifted conv1 scratch
                + 2 * th * W * Cout * 4                      # output block (2x buf)
                + 2 * (Cin * Cw + 9 * Cw * Cw + Cw * Cout) * 2)   # weights
    divisors = [d for d in range(1, H + 1) if H % d == 0]
    if N == 1:
        split = [d for d in divisors
                 if d < H and H // d <= 8 and vmem_bytes(d) <= budget_bytes]
        if split:
            return max(split)
    fitting = [d for d in divisors if vmem_bytes(d) <= budget_bytes]
    return max(fitting) if fitting else 1


def bottleneck_forward_nhwc(x_nhwc, params, *, out_dtype=jnp.float32):
    """Fused Bottleneck forward.  NHWC in / NHWC out (channels-last end to
    end; no layout transposes).  out_dtype=jnp.bfloat16 halves HBM writeback
    if the consumer tolerates it."""
    x = x_nhwc.astype(jnp.bfloat16)
    N, H, W, Cin = x.shape
    if W < 2:
        raise ValueError("W >= 2 required")

    w1 = params['w1'].astype(jnp.bfloat16)
    w2 = params['w2'].astype(jnp.bfloat16)        # (9, Cw, Cw), tap k = ky*3 + kx
    w3 = params['w3'].astype(jnp.bfloat16)
    s1, b1 = params['s1'], params['b1']
    s2, b2 = params['s2'], params['b2']
    s3, b3 = params['s3'], params['b3']
    Cw, Cout = w1.shape[1], w3.shape[1]
    if Cin != Cout:
        raise ValueError(
            f"identity residual requires inplanes == planes*4 (got {Cin} vs {Cout})")

    # ky-grouped 3x3 weights: w2cat[ky, kx*Cw + ci, co] == w2[ky*3 + kx, ci, co]
    w2cat = w2.reshape(3, 3 * Cw, Cw)

    TH = _choose_row_tile(N, H, W, Cin, Cw, Cout)
    n_r = H // TH
    M = N * H * W

    flops = 2 * M * (Cin * Cw + 9 * Cw * Cw + Cw * Cout)
    bytes_accessed = int(x.size * 2 + M * Cout * jnp.dtype(out_dtype).itemsize +
                         (w1.size + w2.size + w3.size) * 2 +
                         (s1.size + b1.size + s2.size + b2.size +
                          s3.size + b3.size) * 4)
    cost = pl.CostEstimate(flops=flops, transcendentals=0,
                           bytes_accessed=bytes_accessed)

    kernel = _make_bottleneck_kernel(TH, W, Cin, Cw, Cout, n_r)

    return pl.pallas_call(
        kernel,
        out_shape=jax.ShapeDtypeStruct((N, H, W, Cout), out_dtype),
        grid_spec=pltpu.PrefetchScalarGridSpec(
            num_scalar_prefetch=0,
            grid=(N, n_r),
            in_specs=[
                # full image per batch index; resident across the row axis
                pl.BlockSpec((1, H, W, Cin), lambda n, r: (n, 0, 0, 0)),
                pl.BlockSpec((Cin, Cw), lambda n, r: (0, 0)),
                pl.BlockSpec((1, Cw), lambda n, r: (0, 0)),
                pl.BlockSpec((1, Cw), lambda n, r: (0, 0)),
                pl.BlockSpec((3, 3 * Cw, Cw), lambda n, r: (0, 0, 0)),
                pl.BlockSpec((1, Cw), lambda n, r: (0, 0)),
                pl.BlockSpec((1, Cw), lambda n, r: (0, 0)),
                pl.BlockSpec((Cw, Cout), lambda n, r: (0, 0)),
                pl.BlockSpec((1, Cout), lambda n, r: (0, 0)),
                pl.BlockSpec((1, Cout), lambda n, r: (0, 0)),
            ],
            out_specs=pl.BlockSpec((1, TH, W, Cout), lambda n, r: (n, r, 0, 0)),
            scratch_shapes=[pltpu.VMEM((TH + 2, W, 3 * Cw), jnp.bfloat16)],
        ),
        compiler_params=pltpu.CompilerParams(
            dimension_semantics=("parallel", "parallel"),
            # ~2 MiB actually used at demo size; well under v7x's 64 MiB physical.
            vmem_limit_bytes=32 * 1024 * 1024),
        cost_estimate=cost,
    )(x, w1, s1, b1, w2cat, s2, b2, w3, s3, b3)


def bottleneck_forward(x_nchw, params):
    """NCHW compatibility adapter (each transpose is a full HBM round trip;
    prefer the NHWC entry point inside a real network)."""
    x = jnp.transpose(x_nchw, (0, 2, 3, 1))
    y = bottleneck_forward_nhwc(x, params)
    return jnp.transpose(y, (0, 3, 1, 2))


# -------------------------- deterministic params ----------------------------

def _fold_bn(gamma, beta, mean, var, eps=1e-5):
    scale = gamma * lax.rsqrt(var + eps)
    bias = beta - mean * scale
    return scale[None, :].astype(jnp.float32), bias[None, :].astype(jnp.float32)


def init_params(key, inplanes, planes, base_width=64, groups=1):
    width = int(planes * (base_width / 64.0)) * groups
    cout = planes * 4
    ks = jax.random.split(key, 15)

    def bn(kg, kb, km, kv, c):
        gamma = 0.5 + jax.random.uniform(kg, (c,), jnp.float32)
        beta = 0.1 * jax.random.normal(kb, (c,), jnp.float32)
        mean = 0.1 * jax.random.normal(km, (c,), jnp.float32)
        var = 0.5 + jax.random.uniform(kv, (c,), jnp.float32)
        return _fold_bn(gamma, beta, mean, var)

    # conv weights stored as (Cin, Cout) for 1x1 and (9, Cin, Cout) for 3x3,
    # fan-in scaled so activations stay O(1).
    w1 = jax.random.normal(ks[0], (inplanes, width), jnp.float32) / jnp.sqrt(inplanes * 1.0)
    w2 = jax.random.normal(ks[1], (9, width, width), jnp.float32) / jnp.sqrt(9.0 * width)
    w3 = jax.random.normal(ks[2], (width, cout), jnp.float32) / jnp.sqrt(width * 1.0)
    s1, b1 = bn(ks[3], ks[4], ks[5], ks[6], width)
    s2, b2 = bn(ks[7], ks[8], ks[9], ks[10], width)
    s3, b3 = bn(ks[11], ks[12], ks[13], ks[14], cout)
    return dict(w1=w1, s1=s1, b1=b1, w2=w2, s2=s2, b2=b2, w3=w3, s3=s3, b3=b3)


# ------------------------------ pure-JAX ref ---------------------------------

def bottleneck_ref_nhwc(x_nhwc, params):
    """Reference with the same bf16 rounding points as the Pallas kernel."""
    f32 = jnp.float32
    x = x_nhwc.astype(jnp.bfloat16).astype(f32)
    w1 = params['w1'].astype(jnp.bfloat16).astype(f32)
    w2 = params['w2'].astype(jnp.bfloat16).astype(f32)
    w3 = params['w3'].astype(jnp.bfloat16).astype(f32)

    y = jnp.einsum('nhwc,cd->nhwd', x, w1)
    y = jnp.maximum(y * params['s1'] + params['b1'], 0.0)
    y = y.astype(jnp.bfloat16).astype(f32)

    w2k = w2.reshape(3, 3, w2.shape[1], w2.shape[2])
    y = lax.conv_general_dilated(y, w2k, window_strides=(1, 1),
                                 padding=((1, 1), (1, 1)),
                                 dimension_numbers=('NHWC', 'HWIO', 'NHWC'))
    y = jnp.maximum(y * params['s2'] + params['b2'], 0.0)
    y = y.astype(jnp.bfloat16).astype(f32)

    y = jnp.einsum('nhwc,cd->nhwd', y, w3)
    y = jnp.maximum(y * params['s3'] + params['b3'] + x, 0.0)
    return y


# ----------------------------------- main ------------------------------------

if __name__ == "__main__":
    key = jax.random.PRNGKey(0)
    kx_, kp = jax.random.split(key)

    # ResNet-50 "layer1" bottleneck channel counts at a small spatial size:
    # inplanes=256, planes=64 -> width=64, out_channels=256 (lane-dense store).
    # NHWC input; the kernel is channels-last end to end (no transposes).
    N, H, W, C = 2, 16, 16, 256
    planes = 64
    x = jax.random.normal(kx_, (N, H, W, C), jnp.float32)
    params = init_params(kp, inplanes=C, planes=planes)

    out = jax.jit(bottleneck_forward_nhwc)(x, params)
    out = jax.block_until_ready(out)

    ref = bottleneck_ref_nhwc(x, params)
    assert out.shape == (N, H, W, planes * 4), out.shape
    max_err = float(jnp.max(jnp.abs(out - ref)))
    assert jnp.allclose(out, ref, rtol=1e-2, atol=1e-2), max_err

    print("KERNEL_OK")
</pallas_src>

<mosaic_0001>
module attributes {stable_mosaic.version = 11 : i64} {
  func.func @kernel(%arg0: i32, %arg1: i32, %arg2: memref<1x16x16x256xbf16, #tpu.memory_space<vmem>>, %arg3: memref<256x64xbf16, #tpu.memory_space<vmem>>, %arg4: memref<1x64xf32, #tpu.memory_space<vmem>>, %arg5: memref<1x64xf32, #tpu.memory_space<vmem>>, %arg6: memref<3x192x64xbf16, #tpu.memory_space<vmem>>, %arg7: memref<1x64xf32, #tpu.memory_space<vmem>>, %arg8: memref<1x64xf32, #tpu.memory_space<vmem>>, %arg9: memref<64x256xbf16, #tpu.memory_space<vmem>>, %arg10: memref<1x256xf32, #tpu.memory_space<vmem>>, %arg11: memref<1x256xf32, #tpu.memory_space<vmem>>, %arg12: memref<1x16x16x256xf32, #tpu.memory_space<vmem>>, %arg13: memref<18x16x192xbf16, #tpu.memory_space<vmem>>) attributes {dimension_semantics = [#tpu.dimension_semantics<parallel>, #tpu.dimension_semantics<parallel>], iteration_bounds = array<i64: 2, 1>, scalar_prefetch = 0 : i64, scratch_operands = 1 : i64, tpu.core_type = #tpu.core_type<tc>, window_params = [{transform_indices = @transform_0, window_bounds = array<i64: 1, 16, 16, 256>}, {pipeline_mode = #tpu.pipeline_mode<synchronous>, transform_indices = @transform_1, window_bounds = array<i64: 256, 64>}, {pipeline_mode = #tpu.pipeline_mode<synchronous>, transform_indices = @transform_2, window_bounds = array<i64: 1, 64>}, {pipeline_mode = #tpu.pipeline_mode<synchronous>, transform_indices = @transform_3, window_bounds = array<i64: 1, 64>}, {pipeline_mode = #tpu.pipeline_mode<synchronous>, transform_indices = @transform_4, window_bounds = array<i64: 3, 192, 64>}, {pipeline_mode = #tpu.pipeline_mode<synchronous>, transform_indices = @transform_5, window_bounds = array<i64: 1, 64>}, {pipeline_mode = #tpu.pipeline_mode<synchronous>, transform_indices = @transform_6, window_bounds = array<i64: 1, 64>}, {pipeline_mode = #tpu.pipeline_mode<synchronous>, transform_indices = @transform_7, window_bounds = array<i64: 64, 256>}, {pipeline_mode = #tpu.pipeline_mode<synchronous>, transform_indices = @transform_8, window_bounds = array<i64: 1, 256>}, {pipeline_mode = #tpu.pipeline_mode<synchronous>, transform_indices = @transform_9, window_bounds = array<i64: 1, 256>}, {transform_indices = @transform_10, window_bounds = array<i64: 1, 16, 16, 256>}]} {
    %c16_i32 = arith.constant 16 : i32
    %0 = arith.muli %arg1, %c16_i32 : i32
    %c0 = arith.constant 0 : index
    %c0_0 = arith.constant 0 : index
    %1 = vector.load %arg3[%c0, %c0_0] : memref<256x64xbf16, #tpu.memory_space<vmem>>, vector<256x64xbf16>
    %c0_1 = arith.constant 0 : index
    %c0_2 = arith.constant 0 : index
    %2 = vector.load %arg4[%c0_1, %c0_2] : memref<1x64xf32, #tpu.memory_space<vmem>>, vector<1x64xf32>
    %c0_3 = arith.constant 0 : index
    %c0_4 = arith.constant 0 : index
    %3 = vector.load %arg5[%c0_3, %c0_4] : memref<1x64xf32, #tpu.memory_space<vmem>>, vector<1x64xf32>
    %c0_5 = arith.constant 0 : index
    %4 = arith.index_cast %0 : i32 to index
    %c0_6 = arith.constant 0 : index
    %c0_7 = arith.constant 0 : index
    %5 = vector.load %arg2[%c0_5, %4, %c0_6, %c0_7] : memref<1x16x16x256xbf16, #tpu.memory_space<vmem>>, vector<1x16x16x256xbf16>
    %6 = vector.shape_cast %5 : vector<1x16x16x256xbf16> to vector<256x256xbf16>
    %cst = arith.constant dense<0.000000e+00> : vector<256x64xf32>
    %7 = tpu.matmul %6, %1, %cst {dimension_numbers = #tpu.dot_dimension_numbers<[1], [0], [0], [1], [0, 0, 1, 1], [], []>} : vector<256x256xbf16>, vector<256x64xbf16>, vector<256x64xf32> -> vector<256x64xf32>
    %8 = vector.broadcast %2 : vector<1x64xf32> to vector<256x64xf32>
    %9 = arith.mulf %7, %8 : vector<256x64xf32>
    %10 = vector.broadcast %3 : vector<1x64xf32> to vector<256x64xf32>
    %11 = arith.addf %9, %10 : vector<256x64xf32>
    %cst_8 = arith.constant 0.000000e+00 : f32
    %12 = vector.broadcast %cst_8 : f32 to vector<256x64xf32>
    %13 = arith.maximumf %11, %12 : vector<256x64xf32>
    %14 = vector.shape_cast %13 : vector<256x64xf32> to vector<16x16x64xf32>
    %15 = arith.truncf %14 : vector<16x16x64xf32> to vector<16x16x64xbf16>
    %cst_9 = arith.constant 0.000000e+00 : bf16
    %16 = vector.broadcast %cst_9 : bf16 to vector<16x1x64xbf16>
    %17 = vector.extract_strided_slice %15 {offsets = [0, 0, 0], sizes = [16, 15, 64], strides = [1, 1, 1]} : vector<16x16x64xbf16> to vector<16x15x64xbf16>
    %18 = tpu.concatenate %16, %17 in 1 : vector<16x1x64xbf16>, vector<16x15x64xbf16> -> vector<16x16x64xbf16>
    %19 = vector.extract_strided_slice %15 {offsets = [0, 1, 0], sizes = [16, 15, 64], strides = [1, 1, 1]} : vector<16x16x64xbf16> to vector<16x15x64xbf16>
    %20 = tpu.concatenate %19, %16 in 1 : vector<16x15x64xbf16>, vector<16x1x64xbf16> -> vector<16x16x64xbf16>
    %21 = tpu.concatenate %18, %15, %20 in 2 : vector<16x16x64xbf16>, vector<16x16x64xbf16>, vector<16x16x64xbf16> -> vector<16x16x192xbf16>
    %c1 = arith.constant 1 : index
    %c0_10 = arith.constant 0 : index
    %c0_11 = arith.constant 0 : index
    %22 = vector.load %arg13[%c1, %c0_10, %c0_11] : memref<18x16x192xbf16, #tpu.memory_space<vmem>>, vector<16x16x192xbf16>
    tpu.vector_store %arg13[%c1, %c0_10, %c0_11], %21 {strides = array<i32>} : memref<18x16x192xbf16, #tpu.memory_space<vmem>>, vector<16x16x192xbf16>,
    %cst_12 = arith.constant 0.000000e+00 : bf16
    %23 = vector.broadcast %cst_12 : bf16 to vector<1x16x192xbf16>
    %c0_13 = arith.constant 0 : index
    %c0_14 = arith.constant 0 : index
    %c0_15 = arith.constant 0 : index
    %24 = vector.load %arg13[%c0_13, %c0_14, %c0_15] : memref<18x16x192xbf16, #tpu.memory_space<vmem>>, vector<1x16x192xbf16>
    tpu.vector_store %arg13[%c0_13, %c0_14, %c0_15], %23 {strides = array<i32>} : memref<18x16x192xbf16, #tpu.memory_space<vmem>>, vector<1x16x192xbf16>,
    %c17 = arith.constant 17 : index
    %c0_16 = arith.constant 0 : index
    %c0_17 = arith.constant 0 : index
    %25 = vector.load %arg13[%c17, %c0_16, %c0_17] : memref<18x16x192xbf16, #tpu.memory_space<vmem>>, vector<1x16x192xbf16>
    tpu.vector_store %arg13[%c17, %c0_16, %c0_17], %23 {strides = array<i32>} : memref<18x16x192xbf16, #tpu.memory_space<vmem>>, vector<1x16x192xbf16>,
    %c0_18 = arith.constant 0 : index
    %c0_19 = arith.constant 0 : index
    %c0_20 = arith.constant 0 : index
    %26 = vector.load %arg13[%c0_18, %c0_19, %c0_20] : memref<18x16x192xbf16, #tpu.memory_space<vmem>>, vector<16x16x192xbf16>
    %27 = vector.shape_cast %26 : vector<16x16x192xbf16> to vector<256x192xbf16>
    %c0_21 = arith.constant 0 : index
    %c0_22 = arith.constant 0 : index
    %c0_23 = arith.constant 0 : index
    %28 = vector.load %arg6[%c0_21, %c0_22, %c0_23] : memref<3x192x64xbf16, #tpu.memory_space<vmem>>, vector<1x192x64xbf16>
    %29 = vector.shape_cast %28 : vector<1x192x64xbf16> to vector<192x64xbf16>
    %cst_24 = arith.constant dense<0.000000e+00> : vector<256x64xf32>
    %30 = tpu.matmul %27, %29, %cst_24 {dimension_numbers = #tpu.dot_dimension_numbers<[1], [0], [0], [1], [0, 0, 1, 1], [], []>} : vector<256x192xbf16>, vector<192x64xbf16>, vector<256x64xf32> -> vector<256x64xf32>
    %c1_25 = arith.constant 1 : index
    %c0_26 = arith.constant 0 : index
    %c0_27 = arith.constant 0 : index
    %31 = vector.load %arg13[%c1_25, %c0_26, %c0_27] : memref<18x16x192xbf16, #tpu.memory_space<vmem>>, vector<16x16x192xbf16>
    %32 = vector.shape_cast %31 : vector<16x16x192xbf16> to vector<256x192xbf16>
    %c1_28 = arith.constant 1 : index
    %c0_29 = arith.constant 0 : index
    %c0_30 = arith.constant 0 : index
    %33 = vector.load %arg6[%c1_28, %c0_29, %c0_30] : memref<3x192x64xbf16, #tpu.memory_space<vmem>>, vector<1x192x64xbf16>
    %34 = vector.shape_cast %33 : vector<1x192x64xbf16> to vector<192x64xbf16>
    %cst_31 = arith.constant dense<0.000000e+00> : vector<256x64xf32>
    %35 = tpu.matmul %32, %34, %cst_31 {dimension_numbers = #tpu.dot_dimension_numbers<[1], [0], [0], [1], [0, 0, 1, 1], [], []>} : vector<256x192xbf16>, vector<192x64xbf16>, vector<256x64xf32> -> vector<256x64xf32>
    %36 = arith.addf %30, %35 : vector<256x64xf32>
    %c2 = arith.constant 2 : index
    %c0_32 = arith.constant 0 : index
    %c0_33 = arith.constant 0 : index
    %37 = vector.load %arg13[%c2, %c0_32, %c0_33] : memref<18x16x192xbf16, #tpu.memory_space<vmem>>, vector<16x16x192xbf16>
    %38 = vector.shape_cast %37 : vector<16x16x192xbf16> to vector<256x192xbf16>
    %c2_34 = arith.constant 2 : index
    %c0_35 = arith.constant 0 : index
    %c0_36 = arith.constant 0 : index
    %39 = vector.load %arg6[%c2_34, %c0_35, %c0_36] : memref<3x192x64xbf16, #tpu.memory_space<vmem>>, vector<1x192x64xbf16>
    %40 = vector.shape_cast %39 : vector<1x192x64xbf16> to vector<192x64xbf16>
    %cst_37 = arith.constant dense<0.000000e+00> : vector<256x64xf32>
    %41 = tpu.matmul %38, %40, %cst_37 {dimension_numbers = #tpu.dot_dimension_numbers<[1], [0], [0], [1], [0, 0, 1, 1], [], []>} : vector<256x192xbf16>, vector<192x64xbf16>, vector<256x64xf32> -> vector<256x64xf32>
    %42 = arith.addf %36, %41 : vector<256x64xf32>
    %c0_38 = arith.constant 0 : index
    %c0_39 = arith.constant 0 : index
    %43 = vector.load %arg7[%c0_38, %c0_39] : memref<1x64xf32, #tpu.memory_space<vmem>>, vector<1x64xf32>
    %44 = vector.broadcast %43 : vector<1x64xf32> to vector<256x64xf32>
    %45 = arith.mulf %42, %44 : vector<256x64xf32>
    %c0_40 = arith.constant 0 : index
    %c0_41 = arith.constant 0 : index
    %46 = vector.load %arg8[%c0_40, %c0_41] : memref<1x64xf32, #tpu.memory_space<vmem>>, vector<1x64xf32>
    %47 = vector.broadcast %46 : vector<1x64xf32> to vector<256x64xf32>
    %48 = arith.addf %45, %47 : vector<256x64xf32>
    %cst_42 = arith.constant 0.000000e+00 : f32
    %49 = vector.broadcast %cst_42 : f32 to vector<256x64xf32>
    %50 = arith.maximumf %48, %49 : vector<256x64xf32>
    %51 = arith.truncf %50 : vector<256x64xf32> to vector<256x64xbf16>
    %c0_43 = arith.constant 0 : index
    %c0_44 = arith.constant 0 : index
    %52 = vector.load %arg9[%c0_43, %c0_44] : memref<64x256xbf16, #tpu.memory_space<vmem>>, vector<64x256xbf16>
    %cst_45 = arith.constant dense<0.000000e+00> : vector<256x256xf32>
    %53 = tpu.matmul %51, %52, %cst_45 {dimension_numbers = #tpu.dot_dimension_numbers<[1], [0], [0], [1], [0, 0, 1, 1], [], []>} : vector<256x64xbf16>, vector<64x256xbf16>, vector<256x256xf32> -> vector<256x256xf32>
    %c0_46 = arith.constant 0 : index
    %54 = arith.index_cast %0 : i32 to index
    %c0_47 = arith.constant 0 : index
    %c0_48 = arith.constant 0 : index
    %55 = vector.load %arg2[%c0_46, %54, %c0_47, %c0_48] : memref<1x16x16x256xbf16, #tpu.memory_space<vmem>>, vector<1x16x16x256xbf16>
    %56 = vector.shape_cast %55 : vector<1x16x16x256xbf16> to vector<256x256xbf16>
    %c0_49 = arith.constant 0 : index
    %c0_50 = arith.constant 0 : index
    %57 = vector.load %arg10[%c0_49, %c0_50] : memref<1x256xf32, #tpu.memory_space<vmem>>, vector<1x256xf32>
    %58 = vector.broadcast %57 : vector<1x256xf32> to vector<256x256xf32>
    %59 = arith.mulf %53, %58 : vector<256x256xf32>
    %c0_51 = arith.constant 0 : index
    %c0_52 = arith.constant 0 : index
    %60 = vector.load %arg11[%c0_51, %c0_52] : memref<1x256xf32, #tpu.memory_space<vmem>>, vector<1x256xf32>
    %61 = vector.broadcast %60 : vector<1x256xf32> to vector<256x256xf32>
    %62 = arith.addf %59, %61 : vector<256x256xf32>
    %63 = arith.extf %56 : vector<256x256xbf16> to vector<256x256xf32>
    %64 = arith.addf %62, %63 : vector<256x256xf32>
    %cst_53 = arith.constant 0.000000e+00 : f32
    %65 = vector.broadcast %cst_53 : f32 to vector<256x256xf32>
    %66 = arith.maximumf %64, %65 : vector<256x256xf32>
    %67 = vector.shape_cast %66 : vector<256x256xf32> to vector<1x16x16x256xf32>
    %c0_54 = arith.constant 0 : index
    %c0_55 = arith.constant 0 : index
    %c0_56 = arith.constant 0 : index
    %c0_57 = arith.constant 0 : index
    %68 = vector.load %arg12[%c0_54, %c0_55, %c0_56, %c0_57] : memref<1x16x16x256xf32, #tpu.memory_space<vmem>>, vector<1x16x16x256xf32>
    tpu.vector_store %arg12[%c0_54, %c0_55, %c0_56, %c0_57], %67 {strides = array<i32>} : memref<1x16x16x256xf32, #tpu.memory_space<vmem>>, vector<1x16x16x256xf32>,
    return
  }
  func.func @transform_0(%arg0: i32, %arg1: i32) -> (i32, i32, i32, i32) {
    %c0_i32 = arith.constant 0 : i32
    %c0_i32_0 = arith.constant 0 : i32
    %c0_i32_1 = arith.constant 0 : i32
    %c0_i32_2 = arith.constant 0 : i32
    return %arg0, %c0_i32, %c0_i32_0, %c0_i32_1 : i32, i32, i32, i32
  }
  func.func @transform_1(%arg0: i32, %arg1: i32) -> (i32, i32) {
    %c0_i32 = arith.constant 0 : i32
    %c0_i32_0 = arith.constant 0 : i32
    %c0_i32_1 = arith.constant 0 : i32
    return %c0_i32, %c0_i32_0 : i32, i32
  }
  func.func @transform_2(%arg0: i32, %arg1: i32) -> (i32, i32) {
    %c0_i32 = arith.constant 0 : i32
    %c0_i32_0 = arith.constant 0 : i32
    %c0_i32_1 = arith.constant 0 : i32
    return %c0_i32, %c0_i32_0 : i32, i32
  }
  func.func @transform_3(%arg0: i32, %arg1: i32) -> (i32, i32) {
    %c0_i32 = arith.constant 0 : i32
    %c0_i32_0 = arith.constant 0 : i32
    %c0_i32_1 = arith.constant 0 : i32
    return %c0_i32, %c0_i32_0 : i32, i32
  }
  func.func @transform_4(%arg0: i32, %arg1: i32) -> (i32, i32, i32) {
    %c0_i32 = arith.constant 0 : i32
    %c0_i32_0 = arith.constant 0 : i32
    %c0_i32_1 = arith.constant 0 : i32
    %c0_i32_2 = arith.constant 0 : i32
    return %c0_i32, %c0_i32_0, %c0_i32_1 : i32, i32, i32
  }
  func.func @transform_5(%arg0: i32, %arg1: i32) -> (i32, i32) {
    %c0_i32 = arith.constant 0 : i32
    %c0_i32_0 = arith.constant 0 : i32
    %c0_i32_1 = arith.constant 0 : i32
    return %c0_i32, %c0_i32_0 : i32, i32
  }
  func.func @transform_6(%arg0: i32, %arg1: i32) -> (i32, i32) {
    %c0_i32 = arith.constant 0 : i32
    %c0_i32_0 = arith.constant 0 : i32
    %c0_i32_1 = arith.constant 0 : i32
    return %c0_i32, %c0_i32_0 : i32, i32
  }
  func.func @transform_7(%arg0: i32, %arg1: i32) -> (i32, i32) {
    %c0_i32 = arith.constant 0 : i32
    %c0_i32_0 = arith.constant 0 : i32
    %c0_i32_1 = arith.constant 0 : i32
    return %c0_i32, %c0_i32_0 : i32, i32
  }
  func.func @transform_8(%arg0: i32, %arg1: i32) -> (i32, i32) {
    %c0_i32 = arith.constant 0 : i32
    %c0_i32_0 = arith.constant 0 : i32
    %c0_i32_1 = arith.constant 0 : i32
    return %c0_i32, %c0_i32_0 : i32, i32
  }
  func.func @transform_9(%arg0: i32, %arg1: i32) -> (i32, i32) {
    %c0_i32 = arith.constant 0 : i32
    %c0_i32_0 = arith.constant 0 : i32
    %c0_i32_1 = arith.constant 0 : i32
    return %c0_i32, %c0_i32_0 : i32, i32
  }
  func.func @transform_10(%arg0: i32, %arg1: i32) -> (i32, i32, i32, i32) {
    %c0_i32 = arith.constant 0 : i32
    %c0_i32_0 = arith.constant 0 : i32
    %c0_i32_1 = arith.constant 0 : i32
    return %arg0, %arg1, %c0_i32, %c0_i32_0 : i32, i32, i32, i32
  }
}

</mosaic_0001>

<bundles_post_ra>
// kernel: bottleneck_forward_nhwc.1
= control target key start
LH: loop header
LB: loop body
LE: loop exit
PB: predicated region body
PF: predicated region fallthrough
CT: control target
= control target key end

     0   :  { %15 = vsyncpa [#allocation4], 0  ;;  %s5381_s0 = inlined_call_operand.vmem [shape: bf16[2,16,16,256], index: 0, kind: input, shape index: {}]   ;;  %s5382_s1 = inlined_call_operand.vmem [shape: bf16[256,64], index: 1, kind: input, shape index: {}]   ;;  %s5383_s2 = inlined_call_operand.vmem [shape: f32[1,64], index: 2, kind: input, shape index: {}]   ;;  %s5384_s3 = inlined_call_operand.vmem [shape: f32[1,64], index: 3, kind: input, shape index: {}]   ;;  %s5385_s4 = inlined_call_operand.vmem [shape: bf16[3,192,64], index: 4, kind: input, shape index: {}]   ;;  %s5386_s5 = inlined_call_operand.vmem [shape: f32[1,64], index: 5, kind: input, shape index: {}]   ;;  %s5387_s6 = inlined_call_operand.vmem [shape: f32[1,64], index: 6, kind: input, shape index: {}]   ;;  %s5388_s7 = inlined_call_operand.vmem [shape: bf16[64,256], index: 7, kind: input, shape index: {}]   ;;  %s5389_s8 = inlined_call_operand.vmem [shape: f32[1,256], index: 8, kind: input, shape index: {}]   ;;  %s5390_s9 = inlined_call_operand.vmem [shape: f32[1,256], index: 9, kind: input, shape index: {}]   ;;  %s5391_s10 = inlined_call_operand.hbm [shape: f32[2,16,16,256], index: 10, kind: output, shape index: {}]  }
   0x1   :  { %17 = vsyncpa [#allocation4 + $0x1], 0  ;;  %s4124_s13 = smov 0   ;;  %s4126_s14 = smov 0  }
   0x2   :  { %s4128_s15 = smov 0   ;;  %s4130_s16 = smov 0  }
   0x3   :  { %s4132_s17 = smov 0   ;;  %s4134_s18 = smov 0  }
   0x4 LB: > { %s3343_s19 = sadd.s32 4294967295, %s4062_s18   ;;  %s3344_s20 = sadd.s32 4294967294, %s4062_s18   ;;  %s4062_s18 = sphi %s4134_s18, %s23_s18   ;;  %s4058_s17 = sphi %s4132_s17, %s5405_s17   ;;  %s4054_s16 = sphi %s4130_s16, %s5404_s16   ;;  %s4050_s15 = sphi %s4128_s15, %s5403_s15   ;;  %s4046_s14 = sphi %s4126_s14, %s5402_s14   ;;  %s4042_s13 = sphi %s4124_s13, %s5401_s13  }
   0x5   : > { %s35_s21 = sadd.s32 1, %s4058_s17  ;;  %s259_s22 = sadd.s32 1, %s4050_s15 }
   0x6   : > { %p37_p0 = scmp.ge.s32.totalorder %s35_s21, 2  ;;  %p269_p1 = scmp.ne.s32.totalorder %s4050_s15, %s4046_s14 }
   0x7   : > { %p270_p2 = scmp.eq.s32.totalorder %s3343_s19, 1  ;;  %p275_p3 = scmp.ne.s32.totalorder %s4046_s14, %s4042_s13 }
   0x8   : > { %s5407_s21 = smov (%p37_p0, %s35_s21), 0  ;;  %p276_p5 = scmp.eq.s32.totalorder %s3344_s20, 1 }
   0x9   : > { %5393 = sst [smem:[#allocation6_spill]] %s5407_s21  ;;  %p4164_p4 = por %p270_p2, %p269_p1 }
   0xa   : > { %s254_s24 = ssub.s32 %s4058_s17, %s5407_s21  ;;  %p3347_p6 = scmp.ge.s32.totalorder %s4062_s18, 1 }
   0xb   : > { %p257_p7 = scmp.eq.s32.totalorder %s254_s24, 0  ;;  %p4171_p8 = por %p276_p5, %p275_p3 }
   0xc   : > { %p329_p9 = scmp.lt.s32.totalorder %s4062_s18, 3 }
   0xd   : > { %s4177_s26 = scalar_select %p257_p7, %s4050_s15, %s259_s22  }
   0xe   : > { %p330_p10 = pnand %p3347_p6, %p329_p9 }
   0xf   : > { %v3871_v0 = vld [vmem:[%s5382_s1 + $0x40] sm:$0xff] (!%p330_p10)   ;;  %v3873_v2 = vld [vmem:[%s5382_s1 + $0x48] sm:$0xff] (!%p330_p10)   ;;  %p367_p11 = scmp.lt.s32.totalorder (!%p330_p10), %s4054_s16, 1  ;;  %v3875_v4 = vld [vmem:[%s5382_s1 + $0x50] sm:$0xff] (!%p330_p10)   ;;  %vm1180_vm0 = vcmask (!%p330_p10), 1047552   ;;  %vm1247_vm3 = vcmask (!%p330_p10), 523264  }
  0x10   : > { %333 = sbr.rel (%p330_p10) target bundleno = 1227 (0x4cb), region = 60  ;;  %v3872_v1 = vld [vmem:[%s5382_s1] sm:$0xff] (!%p330_p10)   ;;  %3566 = vmatprep.subr.bf16.mxu0 (!%p330_p10), %v3871_v0  ;;  %v3874_v3 = vld [vmem:[%s5382_s1 + $0x8] sm:$0xff] (!%p330_p10)   ;;  %v3876_v5 = vld [vmem:[%s5382_s1 + $0x10] sm:$0xff] (!%p330_p10)   ;;  %vm1181_vm1 = vsmask.f32 (!%p330_p10), 7424 }
  0x11   : > { %3567 = vmatpush3.bf16.msra.mxu0 (!%p330_p10), %v3872_v1  ;;  %v3877_v6 = vld [vmem:[%s5382_s1 + $0x58] sm:$0xff] (!%p330_p10)   ;;  %v3879_v8 = vld [vmem:[%s5382_s1 + $0x60] sm:$0xff] (!%p330_p10)   ;;  %v3881_v10 = vld [vmem:[%s5382_s1 + $0x68] sm:$0xff] (!%p330_p10)   ;;  %vm1113_vm4 = vcmask (!%p330_p10), 1040384   ;;  %vm1114_vm5 = vsmask.f32 (!%p330_p10), 256 }
  0x12   : > { %3568 = vmatprep.subr.bf16.mxu0 (!%p330_p10), %v3873_v2  ;;  %v3878_v7 = vld [vmem:[%s5382_s1 + $0x18] sm:$0xff] (!%p330_p10)   ;;  %v3880_v9 = vld [vmem:[%s5382_s1 + $0x20] sm:$0xff] (!%p330_p10)   ;;  %v3882_v12 = vld [vmem:[%s5382_s1 + $0x28] sm:$0xff] (!%p330_p10)   ;;  %s4065_s12 = smov (!%p330_p10), 64   ;;  %s364_s22 = sand.u32 (!%p330_p10), 1, %s4046_s14  }
  0x13   : > { %v3883_v13 = vld [vmem:[%s5382_s1 + $0x70] sm:$0xff] (!%p330_p10)   ;;  %v3885_v15 = vld [vmem:[%s5382_s1 + $0x78] sm:$0xff] (!%p330_p10)   ;;  %v4269_v49 = vld [vmem:[%s5383_s2] ss:$0 sm:$0xff] (!%p330_p10)  ;;  %s3348_s21 = sshll.u32 (!%p330_p10), %s364_s22, 9 }
  0x14   : > { %v3884_v14 = vld [vmem:[%s5382_s1 + $0x30] sm:$0xff] (!%p330_p10)   ;;  %v3886_v16 = vld [vmem:[%s5382_s1 + $0x38] sm:$0xff] (!%p330_p10)   ;;  %v4274_v53 = vld [vmem:[%s5384_s3] ss:$0 sm:$0xff] (!%p330_p10) }
  0x15   : > { %3569 = vmatpush3.bf16.msra.mxu0 (!%p330_p10), %v3874_v3  ;;  %vm4288_vm2 = vmand (!%p330_p10), %vm1180_vm0, %vm1181_vm1 }
  0x16   : > { %3570 = vmatprep.subr.bf16.mxu0 (!%p330_p10), %v3875_v4  ;;  %vm4453_vm6 = vmand (!%p330_p10), %vm1113_vm4, %vm1114_vm5 }
  0x17   : > { %s368_s29 = scalar_select %p367_p11, %s4054_s16, 1 }
  0x19   : > { %3571 = vmatpush3.bf16.msra.mxu0 %v3876_v5  ;;  %s3564_s20 = sshll.u32 %s368_s29, 8  ;;  %s4066_s29 = smov [#allocation3]  }
  0x1a   : > { %3572 = vmatprep.subr.bf16.mxu0 %v3877_v6  ;;  %s4211_s28 = scalar_lea.vmem %s5381_s0, %s3564_s20  ;;  %s5110_s20 = scalar_lea.vmem [#allocation3], %s3348_s21 }
  0x1b   : > { %v3889_v11 = vld [vmem:[%s4211_s28 + $0x4] ss:$8 sps:$4 sm:$0xff]   ;;  %v3887_v17 = vld [vmem:[%s4211_s28] ss:$8 sps:$4 sm:$0xff]   ;;  %v3890_v18 = vld [vmem:[%s4211_s28 + $0x14] ss:$8 sps:$4 sm:$0xff]  }
  0x1c   : > { %732 = vmatprep.mubr.bf16.mxu0 %v3889_v11  ;;  %v3892_v19 = vld [vmem:[%s4211_s28 + $0x10] ss:$8 sps:$4 sm:$0xff]   ;;  %v3893_v20 = vld [vmem:[%s4211_s28 + $0x24] ss:$8 sps:$4 sm:$0xff]   ;;  %v3895_v21 = vld [vmem:[%s4211_s28 + $0x20] ss:$8 sps:$4 sm:$0xff]  }
  0x1d   : > { %3573 = vmatpush3.bf16.msra.mxu0 %v3878_v7  ;;  %v3896_v22 = vld [vmem:[%s4211_s28 + $0x34] ss:$8 sps:$4 sm:$0xff]   ;;  %v3898_v23 = vld [vmem:[%s4211_s28 + $0x30] ss:$8 sps:$4 sm:$0xff]   ;;  %v3899_v24 = vld [vmem:[%s4211_s28 + $0x44] ss:$8 sps:$4 sm:$0xff]  }
  0x1e   : > { %3574 = vmatprep.subr.bf16.mxu0 %v3879_v8  ;;  %v3901_v25 = vld [vmem:[%s4211_s28 + $0x40] ss:$8 sps:$4 sm:$0xff]   ;;  %v3902_v26 = vld [vmem:[%s4211_s28 + $0x54] ss:$8 sps:$4 sm:$0xff]   ;;  %v3904_v27 = vld [vmem:[%s4211_s28 + $0x50] ss:$8 sps:$4 sm:$0xff]  }
  0x1f   : > { %v3905_v28 = vld [vmem:[%s4211_s28 + $0x64] ss:$8 sps:$4 sm:$0xff]   ;;  %v3907_v29 = vld [vmem:[%s4211_s28 + $0x60] ss:$8 sps:$4 sm:$0xff]   ;;  %v3908_v30 = vld [vmem:[%s4211_s28 + $0x74] ss:$8 sps:$4 sm:$0xff]  }
  0x20   : > { %v3910_v31 = vld [vmem:[%s4211_s28 + $0x70] ss:$8 sps:$4 sm:$0xff]   ;;  %v3911_v32 = vld [vmem:[%s4211_s28 + $0x84] ss:$8 sps:$4 sm:$0xff]   ;;  %v3913_v33 = vld [vmem:[%s4211_s28 + $0x80] ss:$8 sps:$4 sm:$0xff]  }
  0x21   : > { %3575 = vmatpush3.bf16.msra.mxu0 %v3880_v9  ;;  %v3914_v34 = vld [vmem:[%s4211_s28 + $0x94] ss:$8 sps:$4 sm:$0xff]   ;;  %v3916_v35 = vld [vmem:[%s4211_s28 + $0x90] ss:$8 sps:$4 sm:$0xff]   ;;  %v3917_v36 = vld [vmem:[%s4211_s28 + $0xa4] ss:$8 sps:$4 sm:$0xff]  }
  0x22   : > { %3576 = vmatprep.subr.bf16.mxu0 %v3881_v10  ;;  %v3919_v37 = vld [vmem:[%s4211_s28 + $0xa0] ss:$8 sps:$4 sm:$0xff]   ;;  %v3920_v38 = vld [vmem:[%s4211_s28 + $0xb4] ss:$8 sps:$4 sm:$0xff]   ;;  %v3922_v39 = vld [vmem:[%s4211_s28 + $0xb0] ss:$8 sps:$4 sm:$0xff]  }
  0x23   : > { %v3923_v40 = vld [vmem:[%s4211_s28 + $0xc4] ss:$8 sps:$4 sm:$0xff]   ;;  %v3925_v41 = vld [vmem:[%s4211_s28 + $0xc0] ss:$8 sps:$4 sm:$0xff]   ;;  %v3926_v42 = vld [vmem:[%s4211_s28 + $0xd4] ss:$8 sps:$4 sm:$0xff]  }
  0x24   : > { %v3928_v43 = vld [vmem:[%s4211_s28 + $0xd0] ss:$8 sps:$4 sm:$0xff]   ;;  %v3929_v44 = vld [vmem:[%s4211_s28 + $0xe4] ss:$8 sps:$4 sm:$0xff]   ;;  %v3931_v45 = vld [vmem:[%s4211_s28 + $0xe0] ss:$8 sps:$4 sm:$0xff]  }
  0x25   : > { %3577 = vmatpush3.bf16.msra.mxu0 %v3882_v12  ;;  %v3932_v46 = vld [vmem:[%s4211_s28 + $0xf4] ss:$8 sps:$4 sm:$0xff]   ;;  %v3934_v47 = vld [vmem:[%s4211_s28 + $0xf0] ss:$8 sps:$4 sm:$0xff]   ;;  %s3268_s24 = sshll.u32 %s5110_s20, 4  ;;  %s3988_s19 = sshll.u32 %s4066_s29, 4  ;;  %s5328_s24 = int_to_ptr.vmem [resolvable:$true] %s3268_s24  ;;  %s3989_s19 = int_to_ptr.vmem [resolvable:$false] %s3988_s19 }
  0x26   : > { %3578 = vmatprep.subr.bf16.mxu0 %v3883_v13  ;;  %s3990_s21 = scalar_lea.vmem %s3989_s19, 16384  ;;  %p3991_p1 = scmp.lt.s32.totalorder %s5328_s24, %s3989_s19 }
  0x29   : > { %3579 = vmatpush3.bf16.msra.mxu0 %v3884_v14  ;;  %v3947_v14 = vld [vmem:[%s5385_s4] sm:$0xff]  }
  0x2a   : > { %3580 = vmatprep.subr.bf16.mxu0 %v3885_v15 }
  0x2d   : > { %3581 = vmatpush3.bf16.msra.mxu0 %v3886_v16 }
  0x30   : > { %733 = vmatmul.mubr.bf16.vlgmr.msra.gmra.mrb[0].mxu0 %v3887_v17 }
  0x31   : > { %740 = vmatprep.mubr.bf16.mxu0 %v3890_v18 }
  0x38   : > { %741 = vmatmul.mubr.bf16.gmra.mrb[4].mxu0 %v3892_v19 }
  0x39   : > { %748 = vmatprep.mubr.bf16.mxu0 %v3893_v20 }
  0x40   : > { %749 = vmatmul.mubr.bf16.gmra.mrb[8].mxu0 %v3895_v21 }
  0x41   : > { %756 = vmatprep.mubr.bf16.mxu0 %v3896_v22 }
  0x48   : > { %757 = vmatmul.mubr.bf16.gmra.mrb[12].mxu0 %v3898_v23 }
  0x49   : > { %764 = vmatprep.mubr.bf16.mxu0 %v3899_v24 }
  0x50   : > { %765 = vmatmul.mubr.bf16.gmra.mrb[16].mxu0 %v3901_v25 }
  0x51   : > { %772 = vmatprep.mubr.bf16.mxu0 %v3902_v26 }
  0x58   : > { %773 = vmatmul.mubr.bf16.gmra.mrb[20].mxu0 %v3904_v27 }
  0x59   : > { %780 = vmatprep.mubr.bf16.mxu0 %v3905_v28 }
  0x60   : > { %781 = vmatmul.mubr.bf16.gmra.mrb[24].mxu0 %v3907_v29 }
  0x61   : > { %788 = vmatprep.mubr.bf16.mxu0 %v3908_v30  ;;  %v3935_v30 = vld [vmem:[%s5385_s4 + $0x60] sm:$0xff]  }
  0x68   : > { %789 = vmatmul.mubr.bf16.gmra.mrb[28].mxu0 %v3910_v31  ;;  %v4064_v31 = vmov 0  }
  0x69   : > { %796 = vmatprep.mubr.bf16.mxu0 %v3911_v32  ;;  %3678 = vmatprep.subr.bf16.mxu1 %v4064_v31  ;;  %1345 = vst [vmem:[#allocation2] sm:$0xff] %v4064_v31  ;;  %1346 = vst.msk [vmem:[#allocation2 + $0x8] sm:$0xff] %vm1247_vm3, %v4064_v31 }
  0x6a   : > { %1349 = vst.msk [vmem:[#allocation2 + $0x118] sm:$0xff] %vm1247_vm3, %v4064_v31  ;;  %1583 = vmatprep.subr.bf16.mxu0 %v4064_v31  ;;  %3690 = vmatpush1.bf16.msra.mxu1 %v3935_v30 }
  0x6b   : > { %1584 = vmatpush1.bf16.msra.mxu0 %v3935_v30  ;;  %3679 = vmatprep.subr.bf16.mxu1 %v4064_v31 }
  0x6c   : > { %1585 = vmatprep.subr.bf16.mxu0 %v4064_v31 }
  0x70   : > { %797 = vmatmul.mubr.bf16.gmra.mrb[32].mxu0 %v3913_v33 }
  0x71   : > { %804 = vmatprep.mubr.bf16.mxu0 %v3914_v34 }
  0x78   : > { %805 = vmatmul.mubr.bf16.gmra.mrb[36].mxu0 %v3916_v35  ;;  %v3936_v35 = vld [vmem:[%s5385_s4 + $0x68] sm:$0xff]  }
  0x79   : > { %812 = vmatprep.mubr.bf16.mxu0 %v3917_v36  ;;  %3691 = vmatpush1.bf16.msra.mxu1 %v3936_v35 }
  0x7a   : > { %1586 = vmatpush1.bf16.msra.mxu0 %v3936_v35  ;;  %3680 = vmatprep.subr.bf16.mxu1 %v4064_v31 }
  0x7b   : > { %1587 = vmatprep.subr.bf16.mxu0 %v4064_v31 }
  0x80   : > { %813 = vmatmul.mubr.bf16.gmra.mrb[40].mxu0 %v3919_v37 }
  0x81   : > { %820 = vmatprep.mubr.bf16.mxu0 %v3920_v38 }
  0x88   : > { %821 = vmatmul.mubr.bf16.gmra.mrb[44].mxu0 %v3922_v39 }
  0x89   : > { %828 = vmatprep.mubr.bf16.mxu0 %v3923_v40 }
  0x90   : > { %829 = vmatmul.mubr.bf16.gmra.mrb[48].mxu0 %v3925_v41 }
  0x91   : > { %836 = vmatprep.mubr.bf16.mxu0 %v3926_v42 }
  0x98   : > { %837 = vmatmul.mubr.bf16.gmra.mrb[52].mxu0 %v3928_v43 }
  0x99   : > { %844 = vmatprep.mubr.bf16.mxu0 %v3929_v44 }
  0xa0   : > { %845 = vmatmul.mubr.bf16.gmra.mrb[56].mxu0 %v3931_v45 }
  0xa1   : > { %852 = vmatprep.mubr.bf16.mxu0 %v3932_v46 }
  0xa8   : > { %853 = vmatmul.mubr.bf16.gmra.mrb[60].mxu0 %v3934_v47 }
 0x103   : > { %v3582_v48 = vpop.f32.mrb[0].mxu0 }
 0x104   : > { %v3583_v50 = vpop.f32.mrb[1].mxu0 }
 0x105   : > { %v3584_v51 = vadd.f32 %v3583_v50, %v3582_v48  ;;  %v3585_v52 = vpop.f32.mrb[2].mxu0 }
 0x106   : > { %v3586_v54 = vpop.f32.mrb[3].mxu0 }
 0x107   : > { %v867_v55 = vmul.f32 %v3584_v51, %v4269_v49  ;;  %v3587_v56 = vadd.f32 %v3586_v54, %v3585_v52  ;;  %v3937_v51 = vld [vmem:[%s5385_s4 + $0x70] sm:$0xff]  }
 0x108   : > { %3692 = vmatpush1.bf16.msra.mxu1 %v3937_v51  ;;  %1588 = vmatpush1.bf16.msra.mxu0 %v3937_v51 }
 0x109   : > { %v905_v57 = vadd.f32 %v4274_v53, %v867_v55  ;;  %v868_v58 = vmul.f32 %v3587_v56, %v4269_v49  ;;  %3681 = vmatprep.subr.bf16.mxu1 %v4064_v31  ;;  %1589 = vmatprep.subr.bf16.mxu0 %v4064_v31 }
 0x10b   : > { %v906_v59 = vadd.f32 %v4274_v53, %v868_v58  ;;  %v3588_v60 = vpop.f32.mrb[4].mxu0  ;;  %v937_v62 = vmax.f32 %v905_v57, 0.0 }
 0x10c   : > { %v3589_v61 = vpop.f32.mrb[5].mxu0 }
 0x10d   : > { %v938_v63 = vmax.f32 %v906_v59, 0.0  ;;  %v3590_v0 = vadd.f32 %v3589_v61, %v3588_v60  ;;  %v3591_v1 = vpop.f32.mrb[6].mxu0  ;;  %v3938_v60 = vld [vmem:[%s5385_s4 + $0x78] sm:$0xff]  }
 0x10e   : > { %v3592_v2 = vpop.f32.mrb[7].mxu0  ;;  %3693 = vmatpush1.bf16.msra.mxu1 %v3938_v60  ;;  %1590 = vmatpush1.bf16.msra.mxu0 %v3938_v60 }
 0x10f   : > { %v4280_v3 = vpack.c.bf16 %v938_v63, %v937_v62  ;;  %v869_v4 = vmul.f32 %v3590_v0, %v4269_v49  ;;  %v3593_v5 = vadd.f32 %v3592_v2, %v3591_v1  ;;  %3682 = vmatprep.subr.bf16.mxu1 %v4064_v31  ;;  %1591 = vmatprep.subr.bf16.mxu0 %v4064_v31 }
 0x111   : > { %v986_v6 = vshrl.u32 %v4280_v3, 16  ;;  %v989_v7 = vshll.u32 %v4280_v3, 16  ;;  %v907_v8 = vadd.f32 %v4274_v53, %v869_v4  ;;  %v870_v9 = vmul.f32 %v3593_v5, %v4269_v49 }
 0x113   : > { %v1132_v10 = vrot.slane %v989_v7, 1  ;;  %v908_v11 = vadd.f32 %v4274_v53, %v870_v9  ;;  %v3594_v12 = vpop.f32.mrb[8].mxu0  ;;  %v988_v13 = vrot.slane %v986_v6, 7  ;;  %v939_v15 = vmax.f32 %v907_v8, 0.0 }
 0x114   : > { %v3595_v16 = vpop.f32.mrb[9].mxu0 }
 0x115   : > { %v1133_v17 = vor.u32 %v1132_v10, %v986_v6  ;;  %v940_v18 = vmax.f32 %v908_v11, 0.0  ;;  %v3596_v19 = vadd.f32 %v3595_v16, %v3594_v12  ;;  %v3597_v20 = vpop.f32.mrb[10].mxu0  ;;  %v4292_v21 = vor.u32 %v989_v7, %v988_v13  ;;  %v3939_v11 = vld [vmem:[%s5385_s4 + $0x80] sm:$0xff]  }
 0x116   : > { %v3598_v22 = vpop.f32.mrb[11].mxu0  ;;  %3694 = vmatpush1.bf16.msra.mxu1 %v3939_v11  ;;  %1592 = vmatpush1.bf16.msra.mxu0 %v3939_v11 }
 0x117   : > { %v1183_v23 = vsel %vm4288_vm2, %v1133_v17, 0  ;;  %v871_v24 = vmul.f32 %v3596_v19, %v4269_v49  ;;  %v3599_v25 = vadd.f32 %v3598_v22, %v3597_v20  ;;  %v4297_v26 = vpack.c.bf16 %v940_v18, %v939_v15  ;;  %v3940_v20 = vld [vmem:[%s5385_s4 + $0x88] sm:$0xff]   ;;  %3683 = vmatprep.subr.bf16.mxu1 %v4064_v31  ;;  %1593 = vmatprep.subr.bf16.mxu0 %v4064_v31 }
 0x118   : > { %1314 = vst.msk [vmem:[#allocation2 + $0x18] sm:$0xff] %vm1247_vm3, %v1183_v23 }
 0x119   : > { %v909_v27 = vadd.f32 %v4274_v53, %v871_v24  ;;  %v872_v28 = vmul.f32 %v3599_v25, %v4269_v49  ;;  %v993_v29 = vshrl.u32 %v4297_v26, 16  ;;  %v996_v32 = vshll.u32 %v4297_v26, 16 }
 0x11a   : > { %3695 = vmatpush1.bf16.msra.mxu1 %v3940_v20  ;;  %1594 = vmatpush1.bf16.msra.mxu0 %v3940_v20 }
 0x11b   : > { %v910_v33 = vadd.f32 %v4274_v53, %v872_v28  ;;  %v3600_v34 = vpop.f32.mrb[12].mxu0  ;;  %v995_v36 = vrot.slane %v993_v29, 7  ;;  %v1134_v38 = vrot.slane %v996_v32, 1  ;;  %v941_v39 = vmax.f32 %v909_v27, 0.0  ;;  %3684 = vmatprep.subr.bf16.mxu1 %v4064_v31  ;;  %1595 = vmatprep.subr.bf16.mxu0 %v4064_v31 }
 0x11c   : > { %v3601_v37 = vpop.f32.mrb[13].mxu0 }
 0x11d   : > { %v942_v40 = vmax.f32 %v910_v33, 0.0  ;;  %v3602_v41 = vadd.f32 %v3601_v37, %v3600_v34  ;;  %v3603_v42 = vpop.f32.mrb[14].mxu0  ;;  %v4320_v43 = vor.u32 %v996_v32, %v995_v36  ;;  %v1135_v45 = vor.u32 %v1134_v38, %v993_v29  ;;  %v3941_v37 = vld [vmem:[%s5385_s4 + $0x90] sm:$0xff]  }
 0x11e   : > { %v3604_v44 = vpop.f32.mrb[15].mxu0  ;;  %3696 = vmatpush1.bf16.msra.mxu1 %v3941_v37  ;;  %1596 = vmatpush1.bf16.msra.mxu0 %v3941_v37 }
 0x11f   : > { %v873_v46 = vmul.f32 %v3602_v41, %v4269_v49  ;;  %v3605_v47 = vadd.f32 %v3604_v44, %v3603_v42  ;;  %v1407_v48 = vld [vmem:[#allocation2 + $0x18] sm:$0xff]  ;;  %v4323_v50 = vpack.c.bf16 %v942_v40, %v941_v39  ;;  %v1184_v52 = vsel %vm4288_vm2, %v1135_v45, 0  ;;  %3685 = vmatprep.subr.bf16.mxu1 %v4064_v31  ;;  %1597 = vmatprep.subr.bf16.mxu0 %v4064_v31 }
 0x120   : > { %3437 = vmatprep.mubr.msk.bf16.mxu0 %vm1247_vm3, %v1407_v48  ;;  %1316 = vst.msk [vmem:[#allocation2 + $0x28] sm:$0xff] %vm1247_vm3, %v1184_v52 }
 0x121   : > { %v911_v54 = vadd.f32 %v4274_v53, %v873_v46  ;;  %v874_v55 = vmul.f32 %v3605_v47, %v4269_v49  ;;  %v1000_v56 = vshrl.u32 %v4323_v50, 16  ;;  %v1003_v57 = vshll.u32 %v4323_v50, 16  ;;  %v3942_v46 = vld [vmem:[%s5385_s4 + $0x98] sm:$0xff]  }
 0x122   : > { %3697 = vmatpush1.bf16.msra.mxu1 %v3942_v46  ;;  %1598 = vmatpush1.bf16.msra.mxu0 %v3942_v46 }
 0x123   : > { %v912_v58 = vadd.f32 %v4274_v53, %v874_v55  ;;  %v3606_v59 = vpop.f32.mrb[16].mxu0  ;;  %v1002_v61 = vrot.slane %v1000_v56, 7  ;;  %v1136_v62 = vrot.slane %v1003_v57, 1  ;;  %v943_v63 = vmax.f32 %v911_v54, 0.0  ;;  %3686 = vmatprep.subr.bf16.mxu1 %v4064_v31  ;;  %1599 = vmatprep.subr.bf16.mxu0 %v4064_v31 }
 0x124   : > { %v3607_v0 = vpop.f32.mrb[17].mxu0 }
 0x125   : > { %v944_v1 = vmax.f32 %v912_v58, 0.0  ;;  %v3608_v2 = vadd.f32 %v3607_v0, %v3606_v59  ;;  %v3609_v4 = vpop.f32.mrb[18].mxu0  ;;  %v4344_v5 = vor.u32 %v1003_v57, %v1002_v61  ;;  %v1137_v6 = vor.u32 %v1136_v62, %v1000_v56 }
 0x126   : > { %v3610_v7 = vpop.f32.mrb[19].mxu0 }
 0x127   : > { %v875_v8 = vmul.f32 %v3608_v2, %v4269_v49  ;;  %v3611_v9 = vadd.f32 %v3610_v7, %v3609_v4  ;;  %v4347_v10 = vpack.c.bf16 %v944_v1, %v943_v63  ;;  %v1185_v12 = vsel %vm4288_vm2, %v1137_v6, 0  ;;  %v3943_v63 = vld [vmem:[%s5385_s4 + $0xa0] sm:$0xff]  }
 0x128   : > { %1318 = vst.msk [vmem:[#allocation2 + $0x38] sm:$0xff] %vm1247_vm3, %v1185_v12  ;;  %3698 = vmatpush1.bf16.msra.mxu1 %v3943_v63  ;;  %1600 = vmatpush1.bf16.msra.mxu0 %v3943_v63 }
 0x129   : > { %v913_v13 = vadd.f32 %v4274_v53, %v875_v8  ;;  %v876_v15 = vmul.f32 %v3611_v9, %v4269_v49  ;;  %v1007_v16 = vshrl.u32 %v4347_v10, 16  ;;  %v1010_v17 = vshll.u32 %v4347_v10, 16  ;;  %v3944_v9 = vld [vmem:[%s5385_s4 + $0xa8] sm:$0xff]   ;;  %3687 = vmatprep.subr.bf16.mxu1 %v4064_v31  ;;  %1601 = vmatprep.subr.bf16.mxu0 %v4064_v31 }
 0x12b   : > { %v914_v18 = vadd.f32 %v4274_v53, %v876_v15  ;;  %v3612_v19 = vpop.f32.mrb[20].mxu0  ;;  %v1009_v22 = vrot.slane %v1007_v16, 7  ;;  %v1138_v23 = vrot.slane %v1010_v17, 1  ;;  %v945_v24 = vmax.f32 %v913_v13, 0.0 }
 0x12c   : > { %v3613_v25 = vpop.f32.mrb[21].mxu0  ;;  %3699 = vmatpush1.bf16.msra.mxu1 %v3944_v9  ;;  %1602 = vmatpush1.bf16.msra.mxu0 %v3944_v9 }
 0x12d   : > { %v946_v27 = vmax.f32 %v914_v18, 0.0  ;;  %v3614_v28 = vadd.f32 %v3613_v25, %v3612_v19  ;;  %v3615_v29 = vpop.f32.mrb[22].mxu0  ;;  %v4367_v30 = vor.u32 %v1010_v17, %v1009_v22  ;;  %v1139_v32 = vor.u32 %v1138_v23, %v1007_v16  ;;  %3688 = vmatprep.subr.bf16.mxu1 %v4064_v31  ;;  %1603 = vmatprep.subr.bf16.mxu0 %v4064_v31 }
 0x12e   : > { %v3616_v33 = vpop.f32.mrb[23].mxu0 }
 0x12f   : > { %v877_v34 = vmul.f32 %v3614_v28, %v4269_v49  ;;  %v3617_v35 = vadd.f32 %v3616_v33, %v3615_v29  ;;  %v4370_v36 = vpack.c.bf16 %v946_v27, %v945_v24  ;;  %v1186_v38 = vsel %vm4288_vm2, %v1139_v32, 0 }
 0x130   : > { %1320 = vst.msk [vmem:[#allocation2 + $0x48] sm:$0xff] %vm1247_vm3, %v1186_v38 }
 0x131   : > { %v915_v39 = vadd.f32 %v4274_v53, %v877_v34  ;;  %v878_v40 = vmul.f32 %v3617_v35, %v4269_v49  ;;  %v1014_v41 = vshrl.u32 %v4370_v36, 16  ;;  %v1017_v42 = vshll.u32 %v4370_v36, 16 }
 0x133   : > { %v916_v44 = vadd.f32 %v4274_v53, %v878_v40  ;;  %v3618_v45 = vpop.f32.mrb[24].mxu0  ;;  %v1016_v47 = vrot.slane %v1014_v41, 7  ;;  %v1140_v48 = vrot.slane %v1017_v42, 1  ;;  %v947_v51 = vmax.f32 %v915_v39, 0.0 }
 0x134   : > { %v3619_v52 = vpop.f32.mrb[25].mxu0 }
 0x135   : > { %v948_v54 = vmax.f32 %v916_v44, 0.0  ;;  %v3620_v55 = vadd.f32 %v3619_v52, %v3618_v45  ;;  %v3621_v56 = vpop.f32.mrb[26].mxu0  ;;  %v4390_v57 = vor.u32 %v1017_v42, %v1016_v47  ;;  %v1141_v58 = vor.u32 %v1140_v48, %v1014_v41  ;;  %v3945_v45 = vld [vmem:[%s5385_s4 + $0xb0] sm:$0xff]  }
 0x136   : > { %v3622_v59 = vpop.f32.mrb[27].mxu0  ;;  %3700 = vmatpush1.bf16.msra.mxu1 %v3945_v45  ;;  %1604 = vmatpush1.bf16.msra.mxu0 %v3945_v45 }
 0x137   : > { %v879_v60 = vmul.f32 %v3620_v55, %v4269_v49  ;;  %v3623_v61 = vadd.f32 %v3622_v59, %v3621_v56  ;;  %v4393_v62 = vpack.c.bf16 %v948_v54, %v947_v51  ;;  %v1187_v0 = vsel %vm4288_vm2, %v1141_v58, 0  ;;  %3689 = vmatprep.subr.bf16.mxu1 %v4064_v31  ;;  %1605 = vmatprep.subr.bf16.mxu0 %v4064_v31 }
 0x138   : > { %1322 = vst.msk [vmem:[#allocation2 + $0x58] sm:$0xff] %vm1247_vm3, %v1187_v0 }
 0x139   : > { %v917_v1 = vadd.f32 %v4274_v53, %v879_v60  ;;  %v880_v2 = vmul.f32 %v3623_v61, %v4269_v49  ;;  %v1021_v4 = vshrl.u32 %v4393_v62, 16  ;;  %v1024_v6 = vshll.u32 %v4393_v62, 16  ;;  %v3946_v60 = vld [vmem:[%s5385_s4 + $0xb8] sm:$0xff]  }
 0x13a   : > { %3701 = vmatpush1.bf16.msra.mxu1 %v3946_v60  ;;  %1606 = vmatpush1.bf16.msra.mxu0 %v3946_v60 }
 0x13b   : > { %v918_v7 = vadd.f32 %v4274_v53, %v880_v2  ;;  %v3624_v8 = vpop.f32.mrb[28].mxu0  ;;  %v1023_v11 = vrot.slane %v1021_v4, 7  ;;  %v1142_v12 = vrot.slane %v1024_v6, 1  ;;  %v949_v13 = vmax.f32 %v917_v1, 0.0  ;;  %1864 = vmatprep.subr.bf16.mxu1 %v4064_v31 }
 0x13c   : > { %v3625_v15 = vpop.f32.mrb[29].mxu0 }
 0x13d   : > { %v950_v16 = vmax.f32 %v918_v7, 0.0  ;;  %v3626_v17 = vadd.f32 %v3625_v15, %v3624_v8  ;;  %v3627_v18 = vpop.f32.mrb[30].mxu0  ;;  %v4413_v19 = vor.u32 %v1024_v6, %v1023_v11  ;;  %v1143_v20 = vor.u32 %v1142_v12, %v1021_v4  ;;  %v3964_v15 = vld [vmem:[%s5385_s4 + $0xe8] sm:$0xff]  }
 0x13e   : > { %v3628_v22 = vpop.f32.mrb[31].mxu0 }
 0x13f   : > { %v881_v23 = vmul.f32 %v3626_v17, %v4269_v49  ;;  %v3629_v24 = vadd.f32 %v3628_v22, %v3627_v18  ;;  %v4416_v25 = vpack.c.bf16 %v950_v16, %v949_v13  ;;  %v1188_v27 = vsel %vm4288_vm2, %v1143_v20, 0 }
 0x140   : > { %1324 = vst.msk [vmem:[#allocation2 + $0x68] sm:$0xff] %vm1247_vm3, %v1188_v27 }
 0x141   : > { %v919_v28 = vadd.f32 %v4274_v53, %v881_v23  ;;  %v882_v29 = vmul.f32 %v3629_v24, %v4269_v49  ;;  %v1028_v32 = vshrl.u32 %v4416_v25, 16  ;;  %v1031_v33 = vshll.u32 %v4416_v25, 16 }
 0x143   : > { %v920_v34 = vadd.f32 %v4274_v53, %v882_v29  ;;  %v3630_v35 = vpop.f32.mrb[32].mxu0  ;;  %v1030_v37 = vrot.slane %v1028_v32, 7  ;;  %v1144_v38 = vrot.slane %v1031_v33, 1  ;;  %v951_v39 = vmax.f32 %v919_v28, 0.0 }
 0x144   : > { %v3631_v40 = vpop.f32.mrb[33].mxu0 }
 0x145   : > { %v952_v41 = vmax.f32 %v920_v34, 0.0  ;;  %v3632_v42 = vadd.f32 %v3631_v40, %v3630_v35  ;;  %v3633_v44 = vpop.f32.mrb[34].mxu0  ;;  %v4431_v46 = vor.u32 %v1031_v33, %v1030_v37  ;;  %v1145_v47 = vor.u32 %v1144_v38, %v1028_v32 }
 0x146   : > { %v3634_v48 = vpop.f32.mrb[35].mxu0 }
 0x147   : > { %v883_v51 = vmul.f32 %v3632_v42, %v4269_v49  ;;  %v3635_v52 = vadd.f32 %v3634_v48, %v3633_v44  ;;  %v4434_v54 = vpack.c.bf16 %v952_v41, %v951_v39  ;;  %v1189_v55 = vsel %vm4288_vm2, %v1145_v47, 0 }
 0x148   : > { %1326 = vst.msk [vmem:[#allocation2 + $0x78] sm:$0xff] %vm1247_vm3, %v1189_v55 }
 0x149   : > { %v921_v56 = vadd.f32 %v4274_v53, %v883_v51  ;;  %v884_v58 = vmul.f32 %v3635_v52, %v4269_v49  ;;  %v1035_v59 = vshrl.u32 %v4434_v54, 16  ;;  %v1038_v61 = vshll.u32 %v4434_v54, 16 }
 0x14b   : > { %v922_v63 = vadd.f32 %v4274_v53, %v884_v58  ;;  %v3636_v0 = vpop.f32.mrb[36].mxu0  ;;  %v1037_v1 = vrot.slane %v1035_v59, 7  ;;  %v1146_v2 = vrot.slane %v1038_v61, 1  ;;  %v953_v4 = vmax.f32 %v921_v56, 0.0 }
 0x14c   : > { %v3637_v6 = vpop.f32.mrb[37].mxu0 }
 0x14d   : > { %v954_v7 = vmax.f32 %v922_v63, 0.0  ;;  %v3638_v8 = vadd.f32 %v3637_v6, %v3636_v0  ;;  %v3639_v9 = vpop.f32.mrb[38].mxu0  ;;  %v4450_v11 = vor.u32 %v1038_v61, %v1037_v1  ;;  %v1147_v12 = vor.u32 %v1146_v2, %v1035_v59 }
 0x14e   : > { %v3640_v13 = vpop.f32.mrb[39].mxu0 }
 0x14f   : > { %v885_v16 = vmul.f32 %v3638_v8, %v4269_v49  ;;  %v3641_v17 = vadd.f32 %v3640_v13, %v3639_v9  ;;  %v4458_v18 = vpack.c.bf16 %v954_v7, %v953_v4  ;;  %v1123_v20 = vsel %vm4453_vm6, 0, %v4450_v11  ;;  %v3963_v11 = vld [vmem:[%s5385_s4 + $0xe0] sm:$0xff]  }
 0x150   : > { %v1190_v22 = vsel %vm4288_vm2, %v1147_v12, 0 }
 0x151   : > { %v923_v23 = vadd.f32 %v4274_v53, %v885_v16  ;;  %v886_v24 = vmul.f32 %v3641_v17, %v4269_v49  ;;  %v1042_v27 = vshrl.u32 %v4458_v18, 16  ;;  %v1045_v28 = vshll.u32 %v4458_v18, 16  ;;  %1328 = vst.msk [vmem:[#allocation2 + $0x88] sm:$0xff] %vm1247_vm3, %v1190_v22 }
 0x153   : > { %v924_v29 = vadd.f32 %v4274_v53, %v886_v24  ;;  %v3642_v32 = vpop.f32.mrb[40].mxu0  ;;  %v1044_v33 = vrot.slane %v1042_v27, 7  ;;  %v1148_v34 = vrot.slane %v1045_v28, 1  ;;  %v955_v35 = vmax.f32 %v923_v23, 0.0 }
 0x154   : > { %v3643_v37 = vpop.f32.mrb[41].mxu0 }
 0x155   : > { %v956_v38 = vmax.f32 %v924_v29, 0.0  ;;  %v3644_v39 = vadd.f32 %v3643_v37, %v3642_v32  ;;  %v3645_v40 = vpop.f32.mrb[42].mxu0  ;;  %v4471_v41 = vor.u32 %v1045_v28, %v1044_v33  ;;  %v1149_v42 = vor.u32 %v1148_v34, %v1042_v27 }
 0x156   : > { %v3646_v44 = vpop.f32.mrb[43].mxu0 }
 0x157   : > { %v887_v45 = vmul.f32 %v3644_v39, %v4269_v49  ;;  %v3647_v47 = vadd.f32 %v3646_v44, %v3645_v40  ;;  %v978_v48 = vpack.c.bf16 %v956_v38, %v955_v35  ;;  %v1191_v51 = vsel %vm4288_vm2, %v1149_v42, 0 }
 0x158   : > { %1330 = vst.msk [vmem:[#allocation2 + $0x98] sm:$0xff] %vm1247_vm3, %v1191_v51 }
 0x159   : > { %v925_v52 = vadd.f32 %v4274_v53, %v887_v45  ;;  %v888_v55 = vmul.f32 %v3647_v47, %v4269_v49  ;;  %1233 = vrot.lane.b32.xlu0 %v978_v48, %s4065_s12  ;;  %v1049_v56 = vshrl.u32 %v978_v48, 16  ;;  %v1052_v58 = vshll.u32 %v978_v48, 16 }
 0x15b   : > { %v926_v59 = vadd.f32 %v4274_v53, %v888_v55  ;;  %v1150_v60 = vrot.slane %v1052_v58, 1  ;;  %v3648_v61 = vpop.f32.mrb[44].mxu0  ;;  %v1051_v63 = vrot.slane %v1049_v56, 7  ;;  %v957_v0 = vmax.f32 %v925_v52, 0.0 }
 0x15c   : > { %v3649_v1 = vpop.f32.mrb[45].mxu0 }
 0x15d   : > { %v958_v2 = vmax.f32 %v926_v59, 0.0  ;;  %v1151_v4 = vor.u32 %v1150_v60, %v1049_v56  ;;  %v3650_v6 = vadd.f32 %v3649_v1, %v3648_v61  ;;  %v3651_v7 = vpop.f32.mrb[46].mxu0  ;;  %v4481_v8 = vor.u32 %v1052_v58, %v1051_v63 }
 0x15e   : > { %v3652_v9 = vpop.f32.mrb[47].mxu0 }
 0x15f   : > { %v1192_v12 = vsel %vm4288_vm2, %v1151_v4, 0  ;;  %v889_v13 = vmul.f32 %v3650_v6, %v4269_v49  ;;  %v3653_v16 = vadd.f32 %v3652_v9, %v3651_v7  ;;  %v979_v17 = vpack.c.bf16 %v958_v2, %v957_v0 }
 0x160   : > { %1332 = vst.msk [vmem:[#allocation2 + $0xa8] sm:$0xff] %vm1247_vm3, %v1192_v12 }
 0x161   : > { %v927_v22 = vadd.f32 %v4274_v53, %v889_v13  ;;  %v890_v23 = vmul.f32 %v3653_v16, %v4269_v49  ;;  %v1056_v24 = vshrl.u32 %v979_v17, 16  ;;  %1235 = vrot.lane.b32.xlu0 %v979_v17, %s4065_s12  ;;  %v1059_v27 = vshll.u32 %v979_v17, 16 }
 0x163   : > { %v928_v28 = vadd.f32 %v4274_v53, %v890_v23  ;;  %v3654_v29 = vpop.f32.mrb[48].mxu0  ;;  %v1058_v32 = vrot.slane %v1056_v24, 7  ;;  %v1152_v33 = vrot.slane %v1059_v27, 1  ;;  %v959_v34 = vmax.f32 %v927_v22, 0.0 }
 0x164   : > { %v3655_v35 = vpop.f32.mrb[49].mxu0 }
 0x165   : > { %v960_v37 = vmax.f32 %v928_v28, 0.0  ;;  %v3656_v38 = vadd.f32 %v3655_v35, %v3654_v29  ;;  %v3657_v39 = vpop.f32.mrb[50].mxu0  ;;  %v4491_v40 = vor.u32 %v1059_v27, %v1058_v32  ;;  %v1153_v42 = vor.u32 %v1152_v33, %v1056_v24 }
 0x166   : > { %v3658_v44 = vpop.f32.mrb[51].mxu0 }
 0x167   : > { %v891_v45 = vmul.f32 %v3656_v38, %v4269_v49  ;;  %v3659_v47 = vadd.f32 %v3658_v44, %v3657_v39  ;;  %v1425_v48 = vld [vmem:[#allocation2 + $0xa8] sm:$0xff]  ;;  %v980_v51 = vpack.c.bf16 %v960_v37, %v959_v34  ;;  %v1193_v52 = vsel %vm4288_vm2, %v1153_v42, 0 }
 0x168   : > { %3446 = vmatprep.mubr.msk.bf16.mxu1 %vm1247_vm3, %v1425_v48  ;;  %1334 = vst.msk [vmem:[#allocation2 + $0xb8] sm:$0xff] %vm1247_vm3, %v1193_v52 }
 0x169   : > { %v929_v55 = vadd.f32 %v4274_v53, %v891_v45  ;;  %v892_v56 = vmul.f32 %v3659_v47, %v4269_v49  ;;  %1237 = vrot.lane.b32.xlu1 %v980_v51, %s4065_s12  ;;  %v1063_v58 = vshrl.u32 %v980_v51, 16  ;;  %v1066_v59 = vshll.u32 %v980_v51, 16 }
 0x16b   : > { %v930_v60 = vadd.f32 %v4274_v53, %v892_v56  ;;  %v3660_v61 = vpop.f32.mrb[52].mxu0  ;;  %v1065_v63 = vrot.slane %v1063_v58, 7  ;;  %v1154_v0 = vrot.slane %v1066_v59, 1  ;;  %v961_v1 = vmax.f32 %v929_v55, 0.0 }
 0x16c   : > { %v3661_v2 = vpop.f32.mrb[53].mxu0 }
 0x16d   : > { %v962_v4 = vmax.f32 %v930_v60, 0.0  ;;  %v3662_v6 = vadd.f32 %v3661_v2, %v3660_v61  ;;  %v3663_v7 = vpop.f32.mrb[54].mxu0  ;;  %v4502_v9 = vor.u32 %v1066_v59, %v1065_v63  ;;  %v1155_v12 = vor.u32 %v1154_v0, %v1063_v58 }
 0x16e   : > { %v3664_v13 = vpop.f32.mrb[55].mxu0 }
 0x16f   : > { %v893_v16 = vmul.f32 %v3662_v6, %v4269_v49  ;;  %v3665_v17 = vadd.f32 %v3664_v13, %v3663_v7  ;;  %v981_v22 = vpack.c.bf16 %v962_v4, %v961_v1  ;;  %v1194_v23 = vsel %vm4288_vm2, %v1155_v12, 0 }
 0x170   : > { %1336 = vst.msk [vmem:[#allocation2 + $0xc8] sm:$0xff] %vm1247_vm3, %v1194_v23 }
 0x171   : > { %v931_v24 = vadd.f32 %v4274_v53, %v893_v16  ;;  %v894_v27 = vmul.f32 %v3665_v17, %v4269_v49  ;;  %v1070_v28 = vshrl.u32 %v981_v22, 16  ;;  %1239 = vrot.lane.b32.xlu1 %v981_v22, %s4065_s12  ;;  %v1073_v29 = vshll.u32 %v981_v22, 16 }
 0x173   : > { %v932_v32 = vadd.f32 %v4274_v53, %v894_v27  ;;  %v3666_v33 = vpop.f32.mrb[56].mxu0  ;;  %v1072_v34 = vrot.slane %v1070_v28, 7  ;;  %v1156_v35 = vrot.slane %v1073_v29, 1  ;;  %v963_v37 = vmax.f32 %v931_v24, 0.0 }
 0x174   : > { %v3667_v38 = vpop.f32.mrb[57].mxu0 }
 0x175   : > { %v964_v39 = vmax.f32 %v932_v32, 0.0  ;;  %v3668_v42 = vadd.f32 %v3667_v38, %v3666_v33  ;;  %v3669_v44 = vpop.f32.mrb[58].mxu0  ;;  %v4512_v45 = vor.u32 %v1073_v29, %v1072_v34  ;;  %v1157_v47 = vor.u32 %v1156_v35, %v1070_v28 }
 0x176   : > { %v3670_v48 = vpop.f32.mrb[59].mxu0 }
 0x177   : > { %v895_v51 = vmul.f32 %v3668_v42, %v4269_v49  ;;  %v3671_v52 = vadd.f32 %v3670_v48, %v3669_v44  ;;  %v982_v55 = vpack.c.bf16 %v964_v39, %v963_v37  ;;  %v1195_v56 = vsel %vm4288_vm2, %v1157_v47, 0 }
 0x178   : > { %1338 = vst.msk [vmem:[#allocation2 + $0xd8] sm:$0xff] %vm1247_vm3, %v1195_v56 }
 0x179   : > { %v933_v58 = vadd.f32 %v4274_v53, %v895_v51  ;;  %v896_v59 = vmul.f32 %v3671_v52, %v4269_v49  ;;  %v1077_v60 = vshrl.u32 %v982_v55, 16  ;;  %1241 = vrot.lane.b32.xlu0 %v982_v55, %s4065_s12  ;;  %v1080_v61 = vshll.u32 %v982_v55, 16 }
 0x17b   : > { %v934_v63 = vadd.f32 %v4274_v53, %v896_v59  ;;  %v3672_v0 = vpop.f32.mrb[60].mxu0  ;;  %v1079_v1 = vrot.slane %v1077_v60, 7  ;;  %v1158_v2 = vrot.slane %v1080_v61, 1  ;;  %v965_v4 = vmax.f32 %v933_v58, 0.0  ;;  %v4590_v59 = vld [vmem:[#allocation2 + $0xc8] sm:$0xff] }
 0x17c   : > { %v3673_v6 = vpop.f32.mrb[61].mxu0 }
 0x17d   : > { %v966_v7 = vmax.f32 %v934_v63, 0.0  ;;  %v3674_v12 = vadd.f32 %v3673_v6, %v3672_v0  ;;  %v3675_v13 = vpop.f32.mrb[62].mxu0  ;;  %v4522_v16 = vor.u32 %v1080_v61, %v1079_v1  ;;  %v1159_v17 = vor.u32 %v1158_v2, %v1077_v60  ;;  %v3950_v60 = vld [vmem:[%s5385_s4 + $0x18] sm:$0xff]   ;;  %v3952_v2 = vld [vmem:[%s5385_s4 + $0x28] sm:$0xff]  }
 0x17e   : > { %v3676_v22 = vpop.f32.mrb[63].mxu0  ;;  %v1127_v63 = vsel %vm4453_vm6, 0, %v4502_v9  ;;  %v3953_v9 = vld [vmem:[%s5385_s4 + $0x30] sm:$0xff]  }
 0x17f   : > { %v897_v23 = vmul.f32 %v3674_v12, %v4269_v49  ;;  %v3677_v24 = vadd.f32 %v3676_v22, %v3675_v13  ;;  %v983_v27 = vpack.c.bf16 %v966_v7, %v965_v4  ;;  %v1196_v28 = vsel %vm4288_vm2, %v1159_v17, 0  ;;  %v4609_v1 = vld [vmem:[#allocation2 + $0xd8] sm:$0xff] }
 0x180   : > { %1340 = vst.msk [vmem:[#allocation2 + $0xe8] sm:$0xff] %vm1247_vm3, %v1196_v28  ;;  %v1128_v4 = vsel %vm4453_vm6, 0, %v4512_v45  ;;  %v3954_v13 = vld [vmem:[%s5385_s4 + $0x38] sm:$0xff]   ;;  %v3955_v45 = vld [vmem:[%s5385_s4 + $0x40] sm:$0xff]   ;;  %v1129_v17 = vsel %vm4453_vm6, 0, %v4522_v16  ;;  %v3957_v16 = vld [vmem:[%s5385_s4 + $0x50] sm:$0xff]  }
 0x181   : > { %v935_v29 = vadd.f32 %v4274_v53, %v897_v23  ;;  %v898_v32 = vmul.f32 %v3677_v24, %v4269_v49  ;;  %v1084_v33 = vshrl.u32 %v983_v27, 16  ;;  %1243 = vrot.lane.b32.xlu1 %v983_v27, %s4065_s12  ;;  %v1087_v34 = vshll.u32 %v983_v27, 16  ;;  %v3956_v27 = vld [vmem:[%s5385_s4 + $0x48] sm:$0xff]  }
 0x183   : > { %v936_v35 = vadd.f32 %v4274_v53, %v898_v32  ;;  %v1086_v37 = vrot.slane %v1084_v33, 7  ;;  %v1160_v38 = vrot.slane %v1087_v34, 1  ;;  %v967_v39 = vmax.f32 %v935_v29, 0.0 }
 0x185   : > { %v968_v42 = vmax.f32 %v936_v35, 0.0  ;;  %1215 = vrot.lane.b32.xlu1 %v4280_v3, %s4065_s12  ;;  %v4534_v44 = vor.u32 %v1087_v34, %v1086_v37  ;;  %v1161_v47 = vor.u32 %v1160_v38, %v1084_v33  ;;  %v3958_v34 = vld [vmem:[%s5385_s4 + $0x58] sm:$0xff]   ;;  %v1116_v37 = vsel %vm4453_vm6, 0, %v4292_v21 }
 0x186   : > { %v1118_v21 = vsel %vm4453_vm6, 0, %v4344_v5  ;;  %v1120_v5 = vsel %vm4453_vm6, 0, %v4390_v57  ;;  %v1119_v57 = vsel %vm4453_vm6, 0, %v4367_v30  ;;  %v3960_v30 = vld [vmem:[%s5385_s4 + $0xc8] sm:$0xff]  }
 0x187   : > { %v984_v48 = vpack.c.bf16 %v968_v42, %v967_v39  ;;  %v1197_v49 = vsel %vm4288_vm2, %v1161_v47, 0  ;;  %v4628_v12 = vld [vmem:[#allocation2 + $0xe8] sm:$0xff]  ;;  %v1130_v28 = vsel %vm4453_vm6, 0, %v4534_v44 }
 0x188   : > { %1342 = vst.msk [vmem:[#allocation2 + $0xf8] sm:$0xff] %vm1247_vm3, %v1197_v49  ;;  %v4678_v39 = vld [vmem:[#allocation2 + $0x28] sm:$0xff] }
 0x189   : > { %v1091_v51 = vshrl.u32 %v984_v48, 16  ;;  %1245 = vrot.lane.b32.xlu0 %v984_v48, %s4065_s12  ;;  %1219 = vrot.lane.b32.xlu1 %v4323_v50, %s4065_s12  ;;  %v1094_v53 = vshll.u32 %v984_v48, 16  ;;  %v1125_v50 = vsel %vm4453_vm6, 0, %v4481_v8  ;;  %v1351_v48 = vld [vmem:[#allocation2 + $0x8] sm:$0xff] }
 0x18b   : > { %v1093_v52 = vrot.slane %v1091_v51, 7  ;;  %v1162_v55 = vrot.slane %v1094_v53, 1 }
 0x18d   : > { %1217 = vrot.lane.b32.xlu0 %v4297_v26, %s4065_s12  ;;  %1223 = vrot.lane.b32.xlu1 %v4370_v36, %s4065_s12  ;;  %v4546_v3 = vor.u32 %v1094_v53, %v1093_v52  ;;  %v1163_v56 = vor.u32 %v1162_v55, %v1091_v51  ;;  %v4571_v36 = vld [vmem:[#allocation2 + $0xb8] sm:$0xff]  ;;  %v1117_v52 = vsel %vm4453_vm6, 0, %v4320_v43  ;;  %v3959_v43 = vld [vmem:[%s5385_s4 + $0xc0] sm:$0xff]  }
 0x18f   : > { %v1198_v58 = vsel %vm4288_vm2, %v1163_v56, 0  ;;  %v4647_v24 = vld [vmem:[#allocation2 + $0xf8] sm:$0xff]  ;;  %v1131_v42 = vsel %vm4453_vm6, 0, %v4546_v3 }
 0x190   : > { %1344 = vst.msk [vmem:[#allocation2 + $0x108] sm:$0xff] %vm1247_vm3, %v1198_v58  ;;  %v4710_v58 = vld [vmem:[#allocation2 + $0x38] sm:$0xff] }
 0x191   : > { %1221 = vrot.lane.b32.xlu0 %v4347_v10, %s4065_s12  ;;  %1227 = vrot.lane.b32.xlu1 %v4416_v25, %s4065_s12  ;;  %v3949_v25 = vld [vmem:[%s5385_s4 + $0x10] sm:$0xff]  }
 0x195   : > { %1225 = vrot.lane.b32.xlu0 %v4393_v62, %s4065_s12  ;;  %1231 = vrot.lane.b32.xlu1 %v4458_v18, %s4065_s12  ;;  %v3948_v62 = vld [vmem:[%s5385_s4 + $0x8] sm:$0xff]  }
 0x197   : > { %v4666_v33 = vld [vmem:[#allocation2 + $0x108] sm:$0xff] }
 0x199   : > { %1229 = vrot.lane.b32.xlu0 %v4434_v54, %s4065_s12  ;;  %v1126_v54 = vsel %vm4453_vm6, 0, %v4491_v40  ;;  %v3951_v40 = vld [vmem:[%s5385_s4 + $0x20] sm:$0xff]   ;;  %s3984_s12 = scalar_lea.vmem %s5328_s24, 8192 }
 0x19a   : > { %p3985_p12 = scmp.ne.s32.totalorder %s5328_s24, %s3984_s12  ;;  %p3992_p2 = scmp.lt.s32.totalorder %s3990_s21, %s3984_s12 }
 0x19c   : > { %p3986_p13 = pnand %p3985_p12, %p4164_p4  ;;  %p3993_p3 = por %p3992_p2, %p3991_p1 }
 0x19e   : > { %p3987_p0 = pneg %p3986_p13 }
 0x1a0   : > { %p3994_p5 = pnand %p3993_p3, %p3987_p0 }
 0x1cb   : > { %v1234_v26 = vpop.permute.xlu0 %1233 }
 0x1cc   : > { %v4568_v10 = vsel %vm1247_vm3, %v1125_v50, %v1234_v26  ;;  %v1122_v26 = vsel %vm4453_vm6, 0, %v4431_v46  ;;  %v1121_v46 = vsel %vm4453_vm6, 0, %v4413_v19  ;;  %v3961_v19 = vld [vmem:[%s5385_s4 + $0xd0] sm:$0xff]  }
 0x1cd   : > { %1688 = vmatmul.mubr.bf16.vlgmr.msra.gmra.mrb[0].mxu1 %v4568_v10 }
 0x1ce   : > { %1865 = vmatpush1.bf16.msra.mxu1 %v3947_v14  ;;  %3447 = vmatprep.mubr.msk.bf16.mxu1 %vm1247_vm3, %v4571_v36 }
 0x1cf   : > { %1866 = vmatprep.subr.bf16.mxu1 %v4064_v31 }
 0x1d2   : > { %1867 = vmatpush1.bf16.msra.mxu1 %v3948_v62 }
 0x1d3   : > { %v1236_v18 = vpop.permute.xlu0 %1235  ;;  %1868 = vmatprep.subr.bf16.mxu1 %v4064_v31 }
 0x1d4   : > { %v4587_v8 = vsel %vm1247_vm3, %v1126_v54, %v1236_v18  ;;  %v1353_v54 = vld [vmem:[#allocation2 + $0x18] sm:$0xff] }
 0x1d5   : > { %1696 = vmatmul.mubr.bf16.gmra.mrb[4].mxu1 %v4587_v8 }
 0x1d6   : > { %3448 = vmatprep.mubr.msk.bf16.mxu1 %vm1247_vm3, %v4590_v59  ;;  %1869 = vmatpush1.bf16.msra.mxu1 %v3949_v25 }
 0x1d7   : > { %1870 = vmatprep.subr.bf16.mxu1 %v4064_v31 }
 0x1da   : > { %1871 = vmatpush1.bf16.msra.mxu1 %v3950_v60  ;;  %v1124_v60 = vsel %vm4453_vm6, 0, %v4471_v41 }
 0x1db   : > { %v1238_v61 = vpop.permute.xlu1 %1237  ;;  %1872 = vmatprep.subr.bf16.mxu1 %v4064_v31 }
 0x1dc   : > { %v4606_v0 = vsel %vm1247_vm3, %v1127_v63, %v1238_v61 }
 0x1dd   : > { %1704 = vmatmul.mubr.bf16.gmra.mrb[8].mxu1 %v4606_v0 }
 0x1de   : > { %3449 = vmatprep.mubr.msk.bf16.mxu1 %vm1247_vm3, %v4609_v1  ;;  %1873 = vmatpush1.bf16.msra.mxu1 %v3951_v40 }
 0x1df   : > { %1874 = vmatprep.subr.bf16.mxu1 %v4064_v31 }
 0x1e2   : > { %1875 = vmatpush1.bf16.msra.mxu1 %v3952_v2  ;;  %v4748_v2 = vld [vmem:[#allocation2 + $0x48] sm:$0xff] }
 0x1e3   : > { %v1240_v6 = vpop.permute.xlu1 %1239  ;;  %1876 = vmatprep.subr.bf16.mxu1 %v4064_v31 }
 0x1e4   : > { %v4625_v7 = vsel %vm1247_vm3, %v1128_v4, %v1240_v6  ;;  %v3962_v4 = vld [vmem:[%s5385_s4 + $0xd8] sm:$0xff]  }
 0x1e5   : > { %1712 = vmatmul.mubr.bf16.gmra.mrb[12].mxu1 %v4625_v7  ;;  %v4772_v6 = vld [vmem:[#allocation2 + $0x58] sm:$0xff] }
 0x1e6   : > { %3450 = vmatprep.mubr.msk.bf16.mxu1 %vm1247_vm3, %v4628_v12  ;;  %1877 = vmatpush1.bf16.msra.mxu1 %v3953_v9 }
 0x1e7   : > { %1878 = vmatprep.subr.bf16.mxu1 %v4064_v31 }
 0x1ea   : > { %1879 = vmatpush1.bf16.msra.mxu1 %v3954_v13  ;;  %v3965_v13 = vld [vmem:[%s5385_s4 + $0xf0] sm:$0xff]  }
 0x1eb   : > { %v1242_v22 = vpop.permute.xlu0 %1241  ;;  %1880 = vmatprep.subr.bf16.mxu1 %v4064_v31 }
 0x1ec   : > { %v4644_v23 = vsel %vm1247_vm3, %v1129_v17, %v1242_v22  ;;  %v4804_v17 = vld [vmem:[#allocation2 + $0x78] sm:$0xff]  ;;  %v3967_v22 = vld [vmem:[%s5385_s4 + $0x100] sm:$0xff]  }
 0x1ed   : > { %1720 = vmatmul.mubr.bf16.gmra.mrb[16].mxu1 %v4644_v23 }
 0x1ee   : > { %3451 = vmatprep.mubr.msk.bf16.mxu1 %vm1247_vm3, %v4647_v24  ;;  %1881 = vmatpush1.bf16.msra.mxu1 %v3955_v45  ;;  %v3966_v45 = vld [vmem:[%s5385_s4 + $0xf8] sm:$0xff]  }
 0x1ef   : > { %1882 = vmatprep.subr.bf16.mxu1 %v4064_v31 }
 0x1f2   : > { %1883 = vmatpush1.bf16.msra.mxu1 %v3956_v27  ;;  %v3968_v27 = vld [vmem:[%s5385_s4 + $0x108] sm:$0xff]  }
 0x1f3   : > { %v1244_v29 = vpop.permute.xlu1 %1243  ;;  %1884 = vmatprep.subr.bf16.mxu1 %v4064_v31 }
 0x1f4   : > { %v4663_v32 = vsel %vm1247_vm3, %v1130_v28, %v1244_v29  ;;  %v3969_v28 = vld [vmem:[%s5385_s4 + $0x110] sm:$0xff]   ;;  %v3970_v29 = vld [vmem:[%s5385_s4 + $0x118] sm:$0xff]  }
 0x1f5   : > { %1728 = vmatmul.mubr.bf16.gmra.mrb[20].mxu1 %v4663_v32 }
 0x1f6   : > { %3452 = vmatprep.mubr.msk.bf16.mxu1 %vm1247_vm3, %v4666_v33  ;;  %1885 = vmatpush1.bf16.msra.mxu1 %v3957_v16  ;;  %v4820_v16 = vld [vmem:[#allocation2 + $0x88] sm:$0xff] }
 0x1f7   : > { %v1216_v35 = vpop.permute.xlu1 %1215  ;;  %1886 = vmatprep.subr.bf16.mxu1 %v4064_v31 }
 0x1f8   : > { %v1250_v38 = vsel %vm1247_vm3, %v1116_v37, %v1216_v35  ;;  %v1371_v35 = vld [vmem:[#allocation2 + $0xa8] sm:$0xff] }
 0x1f9   : > { %1616 = vmatmul.mubr.bf16.vlgmr.msra.gmra.mrb[64].mxu0 %v1250_v38  ;;  %v3971_v37 = vld [vmem:[%s5388_s7] ss:$8 sps:$4 sm:$0xff]  }
 0x1fa   : > { %3438 = vmatprep.mubr.msk.bf16.mxu0 %vm1247_vm3, %v4678_v39  ;;  %1887 = vmatpush1.bf16.msra.mxu1 %v3958_v34  ;;  %v1423_v34 = vld [vmem:[#allocation2 + $0x98] sm:$0xff] }
 0x1fb   : > { %v1246_v44 = vpop.permute.xlu0 %1245  ;;  %v1220_v47 = vpop.permute.xlu1 %1219  ;;  %2203 = vmatprep.subr.bf16.mxu1 %v4064_v31 }
 0x1fc   : > { %v4690_v49 = vsel %vm1247_vm3, %v1131_v42, %v1246_v44  ;;  %v4693_v51 = vsel %vm1247_vm3, %v1118_v21, %v1220_v47  ;;  %v3974_v42 = vld [vmem:[%s5388_s7 + $0x10] ss:$8 sps:$4 sm:$0xff]   ;;  %v3979_v44 = vld [vmem:[%s5388_s7 + $0x24] ss:$8 sps:$4 sm:$0xff]   ;;  %v3977_v21 = vld [vmem:[%s5388_s7 + $0x20] ss:$8 sps:$4 sm:$0xff]  }
 0x1fd   : > { %1736 = vmatmul.mubr.bf16.gmra.mrb[24].mxu1 %v4690_v49  ;;  %v3982_v47 = vld [vmem:[%s5388_s7 + $0x34] ss:$8 sps:$4 sm:$0xff]  }
 0x1fe   : > { %3465 = vmatprep.mubr.msk.bf16.mxu1 %vm1247_vm3, %v1351_v48  ;;  %v3980_v48 = vld [vmem:[%s5388_s7 + $0x30] ss:$8 sps:$4 sm:$0xff]  }
 0x1ff   : > { %v1218_v53 = vpop.permute.xlu0 %1217  ;;  %v1224_v55 = vpop.permute.xlu1 %1223 }
 0x200   : > { %v4704_v3 = vsel %vm1247_vm3, %v1117_v52, %v1218_v53  ;;  %v4707_v56 = vsel %vm1247_vm3, %v1120_v5, %v1224_v55 }
 0x201   : > { %1624 = vmatmul.mubr.bf16.gmra.mrb[68].mxu0 %v4704_v3 }
 0x202   : > { %3439 = vmatprep.mubr.msk.bf16.mxu0 %vm1247_vm3, %v4710_v58 }
 0x203   : > { %v1222_v14 = vpop.permute.xlu0 %1221  ;;  %v1228_v50 = vpop.permute.xlu1 %1227 }
 0x204   : > { %v4724_v62 = vsel %vm1247_vm3, %v1119_v57, %v1222_v14  ;;  %v4727_v25 = vsel %vm1247_vm3, %v1122_v26, %v1228_v50  ;;  %v2057_v50 = vld [vmem:[#allocation2 + $0x118] sm:$0xff] }
 0x205   : > { %1897 = vmatmul.mubr.bf16.vlgmr.msra.gmra.mrb[28].mxu1 %v4064_v31 }
 0x206   : > { %2204 = vmatpush1.bf16.msra.mxu1 %v3959_v43  ;;  %3466 = vmatprep.mubr.msk.bf16.mxu1 %vm1247_vm3, %v1353_v54 }
 0x207   : > { %v1226_v18 = vpop.permute.xlu0 %1225  ;;  %v1232_v40 = vpop.permute.xlu1 %1231  ;;  %2205 = vmatprep.subr.bf16.mxu1 %v4064_v31  ;;  %v4755_v31 = vld [vmem:[#allocation2] sm:$0xff] }
 0x208   : > { %v4742_v61 = vsel %vm1247_vm3, %v1121_v46, %v1226_v18  ;;  %v4745_v63 = vsel %vm1247_vm3, %v1124_v60, %v1232_v40 }
 0x209   : > { %1632 = vmatmul.mubr.bf16.gmra.mrb[72].mxu0 %v4693_v51 }
 0x20a   : > { %3440 = vmatprep.mubr.msk.bf16.mxu0 %vm1247_vm3, %v4748_v2  ;;  %2206 = vmatpush1.bf16.msra.mxu1 %v3960_v30 }
 0x20b   : > { %v1230_v41 = vpop.permute.xlu0 %1229  ;;  %2207 = vmatprep.subr.bf16.mxu1 %v4755_v31 }
 0x20c   : > { %v4763_v9 = vsel %vm1247_vm3, %v1123_v20, %v1230_v41  ;;  %v4788_v20 = vld [vmem:[#allocation2 + $0x68] sm:$0xff]  ;;  %v4965_v41 = vld [vmem:[%s5386_s5] ss:$0 sm:$0xff] }
 0x20d   : > { %1905 = vmatmul.mubr.bf16.gmra.mrb[32].mxu1 %v1250_v38  ;;  %v3973_v38 = vld [vmem:[%s5388_s7 + $0x4] ss:$8 sps:$4 sm:$0xff]  }
 0x20e   : > { %3467 = vmatprep.mubr.msk.bf16.mxu1 %vm1247_vm3, %v4678_v39  ;;  %2208 = vmatpush1.bf16.msra.mxu1 %v3961_v19 }
 0x20f   : > { %2209 = vmatprep.subr.bf16.mxu1 %v4755_v31  ;;  %2618 = vmatprep.subr.bf16.mxu0 %v3973_v38 }
 0x210   : > { %2619 = vmatpush1.bf16.msra.mxu0 %v3971_v37 }
 0x211   : > { %1640 = vmatmul.mubr.bf16.gmra.mrb[76].mxu0 %v4724_v62 }
 0x212   : > { %3441 = vmatprep.mubr.msk.bf16.mxu0 %vm1247_vm3, %v4772_v6  ;;  %2210 = vmatpush1.bf16.msra.mxu1 %v3962_v4 }
 0x213   : > { %2211 = vmatprep.subr.bf16.mxu1 %v4755_v31 }
 0x215   : > { %1913 = vmatmul.mubr.bf16.gmra.mrb[36].mxu1 %v4704_v3 }
 0x216   : > { %3468 = vmatprep.mubr.msk.bf16.mxu1 %vm1247_vm3, %v4710_v58  ;;  %2212 = vmatpush1.bf16.msra.mxu1 %v3963_v11 }
 0x217   : > { %2213 = vmatprep.subr.bf16.mxu1 %v4755_v31 }
 0x219   : > { %1648 = vmatmul.mubr.bf16.gmra.mrb[80].mxu0 %v4707_v56 }
 0x21a   : > { %3442 = vmatprep.mubr.msk.bf16.mxu0 %vm1247_vm3, %v4788_v20  ;;  %2214 = vmatpush1.bf16.msra.mxu1 %v3964_v15 }
 0x21b   : > { %2215 = vmatprep.subr.bf16.mxu1 %v4755_v31 }
 0x21d   : > { %1921 = vmatmul.mubr.bf16.gmra.mrb[40].mxu1 %v4693_v51 }
 0x21e   : > { %3469 = vmatprep.mubr.msk.bf16.mxu1 %vm1247_vm3, %v4748_v2  ;;  %2216 = vmatpush1.bf16.msra.mxu1 %v3965_v13 }
 0x21f   : > { %2217 = vmatprep.subr.bf16.mxu1 %v4755_v31 }
 0x221   : > { %1656 = vmatmul.mubr.bf16.gmra.mrb[84].mxu0 %v4742_v61 }
 0x222   : > { %3443 = vmatprep.mubr.msk.bf16.mxu0 %vm1247_vm3, %v4804_v17  ;;  %2218 = vmatpush1.bf16.msra.mxu1 %v3966_v45 }
 0x223   : > { %2219 = vmatprep.subr.bf16.mxu1 %v4755_v31 }
 0x225   : > { %1929 = vmatmul.mubr.bf16.gmra.mrb[44].mxu1 %v4724_v62 }
 0x226   : > { %3470 = vmatprep.mubr.msk.bf16.mxu1 %vm1247_vm3, %v4772_v6  ;;  %2220 = vmatpush1.bf16.msra.mxu1 %v3967_v22 }
 0x227   : > { %2221 = vmatprep.subr.bf16.mxu1 %v4755_v31 }
 0x229   : > { %1664 = vmatmul.mubr.bf16.gmra.mrb[88].mxu0 %v4727_v25 }
 0x22a   : > { %3444 = vmatprep.mubr.msk.bf16.mxu0 %vm1247_vm3, %v4820_v16  ;;  %2222 = vmatpush1.bf16.msra.mxu1 %v3968_v27 }
 0x22b   : > { %2223 = vmatprep.subr.bf16.mxu1 %v4755_v31 }
 0x22d   : > { %1937 = vmatmul.mubr.bf16.gmra.mrb[48].mxu1 %v4707_v56 }
 0x22e   : > { %3471 = vmatprep.mubr.msk.bf16.mxu1 %vm1247_vm3, %v4788_v20  ;;  %2224 = vmatpush1.bf16.msra.mxu1 %v3969_v28 }
 0x22f   : > { %2225 = vmatprep.subr.bf16.mxu1 %v4755_v31 }
 0x231   : > { %1672 = vmatmul.mubr.bf16.gmra.mrb[92].mxu0 %v4763_v9 }
 0x232   : > { %3445 = vmatprep.mubr.msk.bf16.mxu0 %vm1247_vm3, %v1423_v34  ;;  %2226 = vmatpush1.bf16.msra.mxu1 %v3970_v29 }
 0x235   : > { %1945 = vmatmul.mubr.bf16.gmra.mrb[52].mxu1 %v4742_v61 }
 0x236   : > { %3472 = vmatprep.mubr.msk.bf16.mxu1 %vm1247_vm3, %v4804_v17 }
 0x239   : > { %1680 = vmatmul.mubr.bf16.gmra.mrb[96].mxu0 %v4745_v63 }
 0x23a   : > { %2650 = vmatprep.mubr.bf16.mxu0 %v4755_v31 }
 0x23d   : > { %1953 = vmatmul.mubr.bf16.gmra.mrb[56].mxu1 %v4727_v25 }
 0x23e   : > { %3473 = vmatprep.mubr.msk.bf16.mxu1 %vm1247_vm3, %v4820_v16 }
 0x245   : > { %1961 = vmatmul.mubr.bf16.gmra.mrb[60].mxu1 %v4763_v9 }
 0x246   : > { %3474 = vmatprep.mubr.msk.bf16.mxu1 %vm1247_vm3, %v1423_v34 }
 0x24d   : > { %1969 = vmatmul.mubr.bf16.gmra.mrb[0].mxu1 %v4745_v63 }
 0x24e   : > { %3475 = vmatprep.mubr.msk.bf16.mxu1 %vm1247_vm3, %v1371_v35 }
 0x255   : > { %1977 = vmatmul.mubr.bf16.gmra.mrb[4].mxu1 %v4568_v10 }
 0x256   : > { %3476 = vmatprep.mubr.msk.bf16.mxu1 %vm1247_vm3, %v4571_v36 }
 0x25d   : > { %1985 = vmatmul.mubr.bf16.gmra.mrb[8].mxu1 %v4587_v8 }
 0x25e   : > { %3477 = vmatprep.mubr.msk.bf16.mxu1 %vm1247_vm3, %v4590_v59 }
 0x265   : > { %1993 = vmatmul.mubr.bf16.gmra.mrb[12].mxu1 %v4606_v0 }
 0x266   : > { %3478 = vmatprep.mubr.msk.bf16.mxu1 %vm1247_vm3, %v4609_v1 }
 0x26d   : > { %2001 = vmatmul.mubr.bf16.gmra.mrb[16].mxu1 %v4625_v7 }
 0x26e   : > { %3479 = vmatprep.mubr.msk.bf16.mxu1 %vm1247_vm3, %v4628_v12 }
 0x275   : > { %2009 = vmatmul.mubr.bf16.gmra.mrb[20].mxu1 %v4644_v23 }
 0x276   : > { %3480 = vmatprep.mubr.msk.bf16.mxu1 %vm1247_vm3, %v4647_v24 }
 0x27d   : > { %2017 = vmatmul.mubr.bf16.gmra.mrb[24].mxu1 %v4663_v32 }
 0x27e   : > { %3517 = vmatprep.mubr.msk.bf16.mxu1 %vm1247_vm3, %v4678_v39  ;;  %v3976_v39 = vld [vmem:[%s5388_s7 + $0x14] ss:$8 sps:$4 sm:$0xff]  }
 0x27f   : > { %2620 = vmatprep.subr.bf16.mxu0 %v3976_v39 }
 0x280   : > { %2621 = vmatpush1.bf16.msra.mxu0 %v3974_v42 }
 0x281   : > { %2622 = vmatprep.subr.bf16.mxu0 %v3979_v44 }
 0x284   : > { %2623 = vmatpush1.bf16.msra.mxu0 %v3977_v21 }
 0x285   : > { %2236 = vmatmul.mubr.bf16.vlgmr.msra.gmra.mrb[28].mxu1 %v4704_v3  ;;  %2624 = vmatprep.subr.bf16.mxu0 %v3982_v47 }
 0x286   : > { %3518 = vmatprep.mubr.msk.bf16.mxu1 %vm1247_vm3, %v4710_v58 }
 0x288   : > { %2625 = vmatpush1.bf16.msra.mxu0 %v3980_v48 }
 0x28d   : > { %2244 = vmatmul.mubr.bf16.gmra.mrb[32].mxu1 %v4693_v51 }
 0x28e   : > { %3519 = vmatprep.mubr.msk.bf16.mxu1 %vm1247_vm3, %v4748_v2 }
 0x295   : > { %2252 = vmatmul.mubr.bf16.gmra.mrb[36].mxu1 %v4724_v62 }
 0x296   : > { %3520 = vmatprep.mubr.msk.bf16.mxu1 %vm1247_vm3, %v4772_v6  ;;  %v4970_v6 = vld [vmem:[%s5387_s6] ss:$0 sm:$0xff] }
 0x29d   : > { %2260 = vmatmul.mubr.bf16.gmra.mrb[40].mxu1 %v4707_v56 }
 0x29e   : > { %3521 = vmatprep.mubr.msk.bf16.mxu1 %vm1247_vm3, %v4788_v20 }
 0x2a5   : > { %2268 = vmatmul.mubr.bf16.gmra.mrb[44].mxu1 %v4742_v61 }
 0x2a6   : > { %3522 = vmatprep.mubr.msk.bf16.mxu1 %vm1247_vm3, %v4804_v17 }
 0x2ad   : > { %2276 = vmatmul.mubr.bf16.gmra.mrb[48].mxu1 %v4727_v25 }
 0x2ae   : > { %3523 = vmatprep.mubr.msk.bf16.mxu1 %vm1247_vm3, %v4820_v16 }
 0x2b5   : > { %2284 = vmatmul.mubr.bf16.gmra.mrb[52].mxu1 %v4763_v9 }
 0x2b6   : > { %3524 = vmatprep.mubr.msk.bf16.mxu1 %vm1247_vm3, %v1423_v34 }
 0x2bd   : > { %2292 = vmatmul.mubr.bf16.gmra.mrb[56].mxu1 %v4745_v63 }
 0x2be   : > { %3525 = vmatprep.mubr.msk.bf16.mxu1 %vm1247_vm3, %v1371_v35 }
 0x2c5   : > { %2300 = vmatmul.mubr.bf16.gmra.mrb[60].mxu1 %v4568_v10 }
 0x2c6   : > { %3526 = vmatprep.mubr.msk.bf16.mxu1 %vm1247_vm3, %v4571_v36 }
 0x2cc   : > { %v1617_v51 = vpop.f32.mrb[64].mxu0 }
 0x2cd   : > { %v1619_v53 = vpop.f32.mrb[65].mxu0  ;;  %2308 = vmatmul.mubr.bf16.gmra.mrb[0].mxu1 %v4587_v8 }
 0x2ce   : > { %v1620_v52 = vpop.f32.mrb[66].mxu0  ;;  %3527 = vmatprep.mubr.msk.bf16.mxu1 %vm1247_vm3, %v4590_v59 }
 0x2cf   : > { %v1622_v5 = vpop.f32.mrb[67].mxu0 }
 0x2d4   : > { %v1625_v55 = vpop.f32.mrb[68].mxu0 }
 0x2d5   : > { %v1627_v3 = vpop.f32.mrb[69].mxu0  ;;  %2316 = vmatmul.mubr.bf16.gmra.mrb[4].mxu1 %v4606_v0 }
 0x2d6   : > { %v1628_v56 = vpop.f32.mrb[70].mxu0  ;;  %3528 = vmatprep.mubr.msk.bf16.mxu1 %vm1247_vm3, %v4609_v1 }
 0x2d7   : > { %v1630_v10 = vpop.f32.mrb[71].mxu0 }
 0x2dc   : > { %v4922_v58 = vpop.f32.mrb[72].mxu0 }
 0x2dd   : > { %v1635_v36 = vpop.f32.mrb[73].mxu0  ;;  %2324 = vmatmul.mubr.bf16.gmra.mrb[8].mxu1 %v4625_v7 }
 0x2de   : > { %v4925_v8 = vpop.f32.mrb[74].mxu0  ;;  %3529 = vmatprep.mubr.msk.bf16.mxu1 %vm1247_vm3, %v4628_v12 }
 0x2df   : > { %v1638_v59 = vpop.f32.mrb[75].mxu0 }
 0x2e4   : > { %v4929_v43 = vpop.f32.mrb[76].mxu0 }
 0x2e5   : > { %v1643_v57 = vpop.f32.mrb[77].mxu0  ;;  %2332 = vmatmul.mubr.bf16.gmra.mrb[12].mxu1 %v4644_v23 }
 0x2e6   : > { %v4932_v0 = vpop.f32.mrb[78].mxu0  ;;  %3530 = vmatprep.mubr.msk.bf16.mxu1 %vm1247_vm3, %v4647_v24 }
 0x2e7   : > { %v1646_v1 = vpop.f32.mrb[79].mxu0 }
 0x2ec   : > { %v4936_v14 = vpop.f32.mrb[80].mxu0 }
 0x2ed   : > { %v1651_v7 = vpop.f32.mrb[81].mxu0  ;;  %2340 = vmatmul.mubr.bf16.gmra.mrb[16].mxu1 %v4663_v32 }
 0x2ee   : > { %v4939_v26 = vpop.f32.mrb[82].mxu0  ;;  %3531 = vmatprep.mubr.msk.bf16.mxu1 %vm1247_vm3, %v4666_v33 }
 0x2ef   : > { %v1654_v12 = vpop.f32.mrb[83].mxu0 }
 0x2f4   : > { %v4943_v62 = vpop.f32.mrb[84].mxu0 }
 0x2f5   : > { %v1659_v23 = vpop.f32.mrb[85].mxu0  ;;  %2348 = vmatmul.mubr.bf16.gmra.mrb[20].mxu1 %v4690_v49 }
 0x2f6   : > { %v4946_v25 = vpop.f32.mrb[86].mxu0  ;;  %3532 = vmatprep.mubr.msk.bf16.mxu1 %vm1247_vm3, %v2057_v50 }
 0x2f7   : > { %v1662_v24 = vpop.f32.mrb[87].mxu0 }
 0x2fc   : > { %v4949_v54 = vpop.f32.mrb[88].mxu0 }
 0x2fd   : > { %v1667_v32 = vpop.f32.mrb[89].mxu0  ;;  %2356 = vmatmul.mubr.bf16.gmra.mrb[24].mxu1 %v4755_v31 }
 0x2fe   : > { %v4952_v30 = vpop.f32.mrb[90].mxu0 }
 0x2ff   : > { %v1670_v33 = vpop.f32.mrb[91].mxu0 }
 0x304   : > { %v4954_v46 = vpop.f32.mrb[92].mxu0 }
 0x305   : > { %v1675_v18 = vpop.f32.mrb[93].mxu0 }
 0x306   : > { %v4956_v60 = vpop.f32.mrb[94].mxu0 }
 0x307   : > { %v1678_v40 = vpop.f32.mrb[95].mxu0 }
 0x30c   : > { %v4958_v49 = vpop.f32.mrb[96].mxu0 }
 0x30d   : > { %v1683_v61 = vpop.f32.mrb[97].mxu0 }
 0x30e   : > { %v4960_v63 = vpop.f32.mrb[98].mxu0 }
 0x30f   : > { %v1686_v2 = vpop.f32.mrb[99].mxu0 }
 0x358   : > { %v2237_v19 = vpop.f32.mrb[28].mxu1 }
 0x359   : > { %v3702_v9 = vadd.f32 %v2237_v19, %v1617_v51  ;;  %v2239_v4 = vpop.f32.mrb[29].mxu1 }
 0x35a   : > { %v2240_v11 = vpop.f32.mrb[30].mxu1 }
 0x35b   : > { %v2403_v15 = vmul.f32 %v3702_v9, %v4965_v41  ;;  %v3703_v20 = vadd.f32 %v2240_v11, %v1620_v52  ;;  %v2242_v13 = vpop.f32.mrb[31].mxu1 }
 0x35d   : > { %v2442_v45 = vadd.f32 %v4970_v6, %v2403_v15  ;;  %v2404_v17 = vmul.f32 %v3703_v20, %v4965_v41 }
 0x35f   : > { %v2443_v22 = vadd.f32 %v4970_v6, %v2404_v17  ;;  %v2474_v16 = vmax.f32 %v2442_v45, 0.0 }
 0x360   : > { %v2245_v27 = vpop.f32.mrb[32].mxu1 }
 0x361   : > { %v2475_v28 = vmax.f32 %v2443_v22, 0.0  ;;  %v3704_v29 = vadd.f32 %v2245_v27, %v1625_v55  ;;  %v2247_v34 = vpop.f32.mrb[33].mxu1 }
 0x362   : > { %v2248_v35 = vpop.f32.mrb[34].mxu1 }
 0x363   : > { %v2506_v37 = vpack.c.bf16 %v2475_v28, %v2474_v16  ;;  %v2405_v38 = vmul.f32 %v3704_v29, %v4965_v41  ;;  %v3705_v39 = vadd.f32 %v2248_v35, %v1628_v56  ;;  %v2250_v42 = vpop.f32.mrb[35].mxu1 }
 0x365   : > { %v2444_v44 = vadd.f32 %v4970_v6, %v2405_v38  ;;  %v2406_v21 = vmul.f32 %v3705_v39, %v4965_v41  ;;  %3543 = vmatmul.mubr.msk.bf16.vlgmr.msra.gmra.mrb[100].mxu0 %vm1247_vm3, %v2506_v37 }
 0x366   : > { %2660 = vmatprep.mubr.bf16.mxu0 %v4755_v31 }
 0x367   : > { %v2445_v47 = vadd.f32 %v4970_v6, %v2406_v21  ;;  %v2476_v51 = vmax.f32 %v2444_v44, 0.0 }
 0x368   : > { %v2253_v48 = vpop.f32.mrb[36].mxu1 }
 0x369   : > { %v2477_v53 = vmax.f32 %v2445_v47, 0.0  ;;  %v3706_v52 = vadd.f32 %v2253_v48, %v4922_v58  ;;  %v2255_v5 = vpop.f32.mrb[37].mxu1 }
 0x36a   : > { %v2256_v55 = vpop.f32.mrb[38].mxu1 }
 0x36b   : > { %v2507_v3 = vpack.c.bf16 %v2477_v53, %v2476_v51  ;;  %v2407_v56 = vmul.f32 %v3706_v52, %v4965_v41  ;;  %v3707_v10 = vadd.f32 %v2256_v55, %v4925_v8  ;;  %v2258_v36 = vpop.f32.mrb[39].mxu1 }
 0x36d   : > { %v2446_v59 = vadd.f32 %v4970_v6, %v2407_v56  ;;  %v2408_v57 = vmul.f32 %v3707_v10, %v4965_v41  ;;  %3544 = vmatmul.mubr.msk.bf16.gmra.mrb[104].mxu0 %vm1247_vm3, %v2507_v3 }
 0x36e   : > { %2670 = vmatprep.mubr.bf16.mxu0 %v4755_v31 }
 0x36f   : > { %v2447_v1 = vadd.f32 %v4970_v6, %v2408_v57  ;;  %v2478_v58 = vmax.f32 %v2446_v59, 0.0 }
 0x370   : > { %v2261_v7 = vpop.f32.mrb[40].mxu1 }
 0x371   : > { %v2479_v12 = vmax.f32 %v2447_v1, 0.0  ;;  %v3708_v50 = vadd.f32 %v2261_v7, %v4929_v43  ;;  %v2263_v23 = vpop.f32.mrb[41].mxu1 }
 0x372   : > { %v2264_v24 = vpop.f32.mrb[42].mxu1 }
 0x373   : > { %v2508_v32 = vpack.c.bf16 %v2479_v12, %v2478_v58  ;;  %v2409_v8 = vmul.f32 %v3708_v50, %v4965_v41  ;;  %v3709_v33 = vadd.f32 %v2264_v24, %v4932_v0  ;;  %v2266_v18 = vpop.f32.mrb[43].mxu1 }
 0x375   : > { %v2448_v40 = vadd.f32 %v4970_v6, %v2409_v8  ;;  %v2410_v61 = vmul.f32 %v3709_v33, %v4965_v41  ;;  %3545 = vmatmul.mubr.msk.bf16.gmra.mrb[108].mxu0 %vm1247_vm3, %v2508_v32 }
 0x376   : > { %2680 = vmatprep.mubr.bf16.mxu0 %v4755_v31 }
 0x377   : > { %v2449_v2 = vadd.f32 %v4970_v6, %v2410_v61  ;;  %v2480_v43 = vmax.f32 %v2448_v40, 0.0 }
 0x378   : > { %v2269_v19 = vpop.f32.mrb[44].mxu1 }
 0x379   : > { %v2481_v9 = vmax.f32 %v2449_v2, 0.0  ;;  %v3710_v4 = vadd.f32 %v2269_v19, %v4936_v14  ;;  %v2271_v11 = vpop.f32.mrb[45].mxu1 }
 0x37a   : > { %v2272_v15 = vpop.f32.mrb[46].mxu1 }
 0x37b   : > { %v2509_v20 = vpack.c.bf16 %v2481_v9, %v2480_v43  ;;  %v2411_v0 = vmul.f32 %v3710_v4, %v4965_v41  ;;  %v3711_v13 = vadd.f32 %v2272_v15, %v4939_v26  ;;  %v2274_v45 = vpop.f32.mrb[47].mxu1 }
 0x37d   : > { %v2450_v17 = vadd.f32 %v4970_v6, %v2411_v0  ;;  %v2412_v22 = vmul.f32 %v3711_v13, %v4965_v41  ;;  %3546 = vmatmul.mubr.msk.bf16.gmra.mrb[112].mxu0 %vm1247_vm3, %v2509_v20 }
 0x37e   : > { %2690 = vmatprep.mubr.bf16.mxu0 %v4755_v31 }
 0x37f   : > { %v2451_v27 = vadd.f32 %v4970_v6, %v2412_v22  ;;  %v2482_v14 = vmax.f32 %v2450_v17, 0.0 }
 0x380   : > { %v2277_v16 = vpop.f32.mrb[48].mxu1 }
 0x381   : > { %v2483_v28 = vmax.f32 %v2451_v27, 0.0  ;;  %v3712_v29 = vadd.f32 %v2277_v16, %v4943_v62  ;;  %v2279_v34 = vpop.f32.mrb[49].mxu1 }
 0x382   : > { %v2280_v35 = vpop.f32.mrb[50].mxu1 }
 0x383   : > { %v2510_v37 = vpack.c.bf16 %v2483_v28, %v2482_v14  ;;  %v2413_v26 = vmul.f32 %v3712_v29, %v4965_v41  ;;  %v3713_v38 = vadd.f32 %v2280_v35, %v4946_v25  ;;  %v2282_v39 = vpop.f32.mrb[51].mxu1 }
 0x385   : > { %v2452_v42 = vadd.f32 %v4970_v6, %v2413_v26  ;;  %v2414_v44 = vmul.f32 %v3713_v38, %v4965_v41  ;;  %3547 = vmatmul.mubr.msk.bf16.gmra.mrb[116].mxu0 %vm1247_vm3, %v2510_v37 }
 0x386   : > { %2700 = vmatprep.mubr.bf16.mxu0 %v4755_v31 }
 0x387   : > { %v2453_v21 = vadd.f32 %v4970_v6, %v2414_v44  ;;  %v2484_v62 = vmax.f32 %v2452_v42, 0.0 }
 0x388   : > { %v2285_v47 = vpop.f32.mrb[52].mxu1 }
 0x389   : > { %v2485_v48 = vmax.f32 %v2453_v21, 0.0  ;;  %v3714_v51 = vadd.f32 %v2285_v47, %v4949_v54  ;;  %v2287_v53 = vpop.f32.mrb[53].mxu1 }
 0x38a   : > { %v2288_v52 = vpop.f32.mrb[54].mxu1 }
 0x38b   : > { %v2511_v5 = vpack.c.bf16 %v2485_v48, %v2484_v62  ;;  %v2415_v25 = vmul.f32 %v3714_v51, %v4965_v41  ;;  %v3715_v55 = vadd.f32 %v2288_v52, %v4952_v30  ;;  %v2290_v3 = vpop.f32.mrb[55].mxu1 }
 0x38d   : > { %v2454_v56 = vadd.f32 %v4970_v6, %v2415_v25  ;;  %v2416_v10 = vmul.f32 %v3715_v55, %v4965_v41  ;;  %3548 = vmatmul.mubr.msk.bf16.gmra.mrb[120].mxu0 %vm1247_vm3, %v2511_v5 }
 0x38e   : > { %2710 = vmatprep.mubr.bf16.mxu0 %v4755_v31 }
 0x38f   : > { %v2455_v36 = vadd.f32 %v4970_v6, %v2416_v10  ;;  %v2486_v54 = vmax.f32 %v2454_v56, 0.0 }
 0x390   : > { %v2293_v59 = vpop.f32.mrb[56].mxu1 }
 0x391   : > { %v2487_v57 = vmax.f32 %v2455_v36, 0.0  ;;  %v3716_v1 = vadd.f32 %v2293_v59, %v4954_v46  ;;  %v2295_v7 = vpop.f32.mrb[57].mxu1 }
 0x392   : > { %v2296_v58 = vpop.f32.mrb[58].mxu1 }
 0x393   : > { %v2512_v12 = vpack.c.bf16 %v2487_v57, %v2486_v54  ;;  %v2417_v30 = vmul.f32 %v3716_v1, %v4965_v41  ;;  %v3717_v50 = vadd.f32 %v2296_v58, %v4956_v60  ;;  %v2298_v23 = vpop.f32.mrb[59].mxu1 }
 0x395   : > { %v2456_v24 = vadd.f32 %v4970_v6, %v2417_v30  ;;  %v2418_v32 = vmul.f32 %v3717_v50, %v4965_v41  ;;  %3549 = vmatmul.mubr.msk.bf16.gmra.mrb[124].mxu0 %vm1247_vm3, %v2512_v12 }
 0x396   : > { %2720 = vmatprep.mubr.bf16.mxu0 %v4755_v31 }
 0x397   : > { %v2457_v8 = vadd.f32 %v4970_v6, %v2418_v32  ;;  %v2488_v46 = vmax.f32 %v2456_v24, 0.0 }
 0x398   : > { %v2301_v33 = vpop.f32.mrb[60].mxu1 }
 0x399   : > { %v2489_v18 = vmax.f32 %v2457_v8, 0.0  ;;  %v3718_v40 = vadd.f32 %v2301_v33, %v4958_v49  ;;  %v2303_v61 = vpop.f32.mrb[61].mxu1 }
 0x39a   : > { %v2304_v2 = vpop.f32.mrb[62].mxu1 }
 0x39b   : > { %v2513_v19 = vpack.c.bf16 %v2489_v18, %v2488_v46  ;;  %v2419_v60 = vmul.f32 %v3718_v40, %v4965_v41  ;;  %v3719_v43 = vadd.f32 %v2304_v2, %v4960_v63  ;;  %v2306_v9 = vpop.f32.mrb[63].mxu1 }
 0x39d   : > { %v2458_v4 = vadd.f32 %v4970_v6, %v2419_v60  ;;  %v2420_v11 = vmul.f32 %v3719_v43, %v4965_v41  ;;  %3550 = vmatmul.mubr.msk.bf16.gmra.mrb[128].mxu0 %vm1247_vm3, %v2513_v19 }
 0x39e   : > { %2730 = vmatprep.mubr.bf16.mxu0 %v4755_v31 }
 0x39f   : > { %v2459_v15 = vadd.f32 %v4970_v6, %v2420_v11  ;;  %v2490_v49 = vmax.f32 %v2458_v4, 0.0 }
 0x3a0   : > { %v2309_v20 = vpop.f32.mrb[0].mxu1 }
 0x3a1   : > { %v2491_v0 = vmax.f32 %v2459_v15, 0.0  ;;  %v2421_v13 = vmul.f32 %v4965_v41, %v2309_v20  ;;  %v2311_v45 = vpop.f32.mrb[1].mxu1 }
 0x3a2   : > { %v2312_v17 = vpop.f32.mrb[2].mxu1 }
 0x3a3   : > { %v2514_v22 = vpack.c.bf16 %v2491_v0, %v2490_v49  ;;  %v2460_v63 = vadd.f32 %v4970_v6, %v2421_v13  ;;  %v2422_v27 = vmul.f32 %v4965_v41, %v2312_v17  ;;  %v2314_v16 = vpop.f32.mrb[3].mxu1 }
 0x3a5   : > { %v2461_v14 = vadd.f32 %v4970_v6, %v2422_v27  ;;  %3551 = vmatmul.mubr.msk.bf16.gmra.mrb[132].mxu0 %vm1247_vm3, %v2514_v22  ;;  %v2492_v28 = vmax.f32 %v2460_v63, 0.0 }
 0x3a6   : > { %2740 = vmatprep.mubr.bf16.mxu0 %v4755_v31 }
 0x3a7   : > { %v2493_v29 = vmax.f32 %v2461_v14, 0.0 }
 0x3a8   : > { %v2317_v34 = vpop.f32.mrb[4].mxu1 }
 0x3a9   : > { %v2515_v35 = vpack.c.bf16 %v2493_v29, %v2492_v28  ;;  %v2423_v37 = vmul.f32 %v4965_v41, %v2317_v34  ;;  %v2319_v26 = vpop.f32.mrb[5].mxu1 }
 0x3aa   : > { %v2320_v38 = vpop.f32.mrb[6].mxu1 }
 0x3ab   : > { %v2462_v39 = vadd.f32 %v4970_v6, %v2423_v37  ;;  %v2424_v42 = vmul.f32 %v4965_v41, %v2320_v38  ;;  %v2322_v44 = vpop.f32.mrb[7].mxu1 }
 0x3ad   : > { %v2463_v21 = vadd.f32 %v4970_v6, %v2424_v42  ;;  %3552 = vmatmul.mubr.msk.bf16.gmra.mrb[136].mxu0 %vm1247_vm3, %v2515_v35  ;;  %v2494_v47 = vmax.f32 %v2462_v39, 0.0  ;;  %v2845_v42 = vlaneseq }
 0x3ae   : > { %2750 = vmatprep.mubr.bf16.mxu0 %v4755_v31 }
 0x3af   : > { %v2495_v62 = vmax.f32 %v2463_v21, 0.0  ;;  %v2846_v44 = vshrl.u32 %v2845_v42, 7 }
 0x3b0   : > { %v2325_v48 = vpop.f32.mrb[8].mxu1 }
 0x3b1   : > { %v2516_v51 = vpack.c.bf16 %v2495_v62, %v2494_v47  ;;  %v2425_v53 = vmul.f32 %v4965_v41, %v2325_v48  ;;  %v2327_v52 = vpop.f32.mrb[9].mxu1  ;;  %v2847_v21 = vsub.s32 0, %v2846_v44  ;;  %v2851_v47 = vsub.s32 1, %v2846_v44  ;;  %v2811_v62 = vld [vmem:[%s4211_s28] sm:$0xff] }
 0x3b2   : > { %v2328_v5 = vpop.f32.mrb[10].mxu1 }
 0x3b3   : > { %v2464_v25 = vadd.f32 %v4970_v6, %v2425_v53  ;;  %v2426_v55 = vmul.f32 %v4965_v41, %v2328_v5  ;;  %v2330_v3 = vpop.f32.mrb[11].mxu1  ;;  %v2812_v5 = vld [vmem:[%s4211_s28 + $0x8] sm:$0xff] }
 0x3b5   : > { %v2465_v56 = vadd.f32 %v4970_v6, %v2426_v55  ;;  %3553 = vmatmul.mubr.msk.bf16.gmra.mrb[140].mxu0 %vm1247_vm3, %v2516_v51  ;;  %v2496_v10 = vmax.f32 %v2464_v25, 0.0  ;;  %v2995_v55 = vunpack.c.l.bf16 %v2811_v62 }
 0x3b6   : > { %2760 = vmatprep.mubr.bf16.mxu0 %v4755_v31 }
 0x3b7   : > { %v2497_v36 = vmax.f32 %v2465_v56, 0.0 }
 0x3b8   : > { %v2333_v59 = vpop.f32.mrb[12].mxu1 }
 0x3b9   : > { %v2517_v54 = vpack.c.bf16 %v2497_v36, %v2496_v10  ;;  %v2427_v57 = vmul.f32 %v4965_v41, %v2333_v59  ;;  %v2335_v1 = vpop.f32.mrb[13].mxu1  ;;  %v2996_v10 = vunpack.c.h.bf16 %v2811_v62 }
 0x3ba   : > { %v2336_v7 = vpop.f32.mrb[14].mxu1 }
 0x3bb   : > { %v2466_v58 = vadd.f32 %v4970_v6, %v2427_v57  ;;  %v2428_v12 = vmul.f32 %v4965_v41, %v2336_v7  ;;  %v2338_v30 = vpop.f32.mrb[15].mxu1  ;;  %v2997_v57 = vunpack.c.l.bf16 %v2812_v5 }
 0x3bd   : > { %v2467_v50 = vadd.f32 %v4970_v6, %v2428_v12  ;;  %3554 = vmatmul.mubr.msk.bf16.gmra.mrb[144].mxu0 %vm1247_vm3, %v2517_v54  ;;  %v2498_v23 = vmax.f32 %v2466_v58, 0.0  ;;  %v2998_v12 = vunpack.c.h.bf16 %v2812_v5 }
 0x3be   : > { %2770 = vmatprep.mubr.bf16.mxu0 %v4755_v31 }
 0x3bf   : > { %v2499_v24 = vmax.f32 %v2467_v50, 0.0 }
 0x3c0   : > { %v2341_v32 = vpop.f32.mrb[16].mxu1 }
 0x3c1   : > { %v2518_v8 = vpack.c.bf16 %v2499_v24, %v2498_v23  ;;  %v2429_v33 = vmul.f32 %v4965_v41, %v2341_v32  ;;  %v2343_v46 = vpop.f32.mrb[17].mxu1  ;;  %v2813_v32 = vld [vmem:[%s4211_s28 + $0x10] sm:$0xff] }
 0x3c2   : > { %v2344_v18 = vpop.f32.mrb[18].mxu1 }
 0x3c3   : > { %v2468_v40 = vadd.f32 %v4970_v6, %v2429_v33  ;;  %v2430_v61 = vmul.f32 %v4965_v41, %v2344_v18  ;;  %v2346_v2 = vpop.f32.mrb[19].mxu1 }
 0x3c5   : > { %v2469_v19 = vadd.f32 %v4970_v6, %v2430_v61  ;;  %3555 = vmatmul.mubr.msk.bf16.gmra.mrb[148].mxu0 %vm1247_vm3, %v2518_v8  ;;  %v2500_v60 = vmax.f32 %v2468_v40, 0.0  ;;  %v2814_v61 = vld [vmem:[%s4211_s28 + $0x18] sm:$0xff] }
 0x3c6   : > { %2780 = vmatprep.mubr.bf16.mxu0 %v4755_v31 }
 0x3c7   : > { %v2501_v43 = vmax.f32 %v2469_v19, 0.0 }
 0x3c8   : > { %v2349_v9 = vpop.f32.mrb[20].mxu1 }
 0x3c9   : > { %v2519_v4 = vpack.c.bf16 %v2501_v43, %v2500_v60  ;;  %v2431_v11 = vmul.f32 %v4965_v41, %v2349_v9  ;;  %v2351_v15 = vpop.f32.mrb[21].mxu1  ;;  %v2999_v60 = vunpack.c.l.bf16 %v2813_v32 }
 0x3ca   : > { %v2352_v20 = vpop.f32.mrb[22].mxu1 }
 0x3cb   : > { %v2470_v49 = vadd.f32 %v4970_v6, %v2431_v11  ;;  %v2432_v0 = vmul.f32 %v4965_v41, %v2352_v20  ;;  %v2354_v13 = vpop.f32.mrb[23].mxu1  ;;  %v3000_v11 = vunpack.c.h.bf16 %v2813_v32 }
 0x3cd   : > { %v2471_v45 = vadd.f32 %v4970_v6, %v2432_v0  ;;  %3556 = vmatmul.mubr.msk.bf16.gmra.mrb[152].mxu0 %vm1247_vm3, %v2519_v4  ;;  %v2502_v17 = vmax.f32 %v2470_v49, 0.0  ;;  %v3001_v0 = vunpack.c.l.bf16 %v2814_v61 }
 0x3ce   : > { %2790 = vmatprep.mubr.bf16.mxu0 %v4755_v31 }
 0x3cf   : > { %v2503_v22 = vmax.f32 %v2471_v45, 0.0 }
 0x3d0   : > { %v2357_v63 = vpop.f32.mrb[24].mxu1 }
 0x3d1   : > { %v2520_v27 = vpack.c.bf16 %v2503_v22, %v2502_v17  ;;  %v2433_v16 = vmul.f32 %v4965_v41, %v2357_v63  ;;  %v2359_v14 = vpop.f32.mrb[25].mxu1  ;;  %v3002_v22 = vunpack.c.h.bf16 %v2814_v61 }
 0x3d2   : > { %v2360_v28 = vpop.f32.mrb[26].mxu1 }
 0x3d3   : > { %v2472_v29 = vadd.f32 %v4970_v6, %v2433_v16  ;;  %v2434_v34 = vmul.f32 %v4965_v41, %v2360_v28  ;;  %v2362_v35 = vpop.f32.mrb[27].mxu1  ;;  %v2843_v41 = vld [vmem:[%s5389_s8] sm:$0x3] }
 0x3d4   : > { %v5090_v48 = vrot.slane %v2843_v41, %v2851_v47  ;;  %v2815_v28 = vld [vmem:[%s4211_s28 + $0x20] sm:$0xff] }
 0x3d5   : > { %v2473_v37 = vadd.f32 %v4970_v6, %v2434_v34  ;;  %3557 = vmatmul.mubr.msk.bf16.gmra.mrb[156].mxu0 %vm1247_vm3, %v2520_v27  ;;  %v2504_v26 = vmax.f32 %v2472_v29, 0.0  ;;  %v2919_v6 = vld [vmem:[%s5390_s9] sm:$0x3]  ;;  %v3003_v44 = vunpack.c.l.bf16 %v2815_v28 }
 0x3d6   : > { %2800 = vmatprep.mubr.bf16.mxu0 %v4755_v31  ;;  %v5087_v31 = vrot.slane %v2843_v41, %v2847_v21  ;;  %v5092_v51 = vrot.slane %v2919_v6, %v2847_v21  ;;  %v5095_v52 = vrot.slane %v2919_v6, %v2851_v47  ;;  %v3004_v6 = vunpack.c.h.bf16 %v2815_v28 }
 0x3d7   : > { %v2505_v38 = vmax.f32 %v2473_v37, 0.0 }
 0x3d9   : > { %v2521_v39 = vpack.c.bf16 %v2505_v38, %v2504_v26  ;;  %v2816_v38 = vld [vmem:[%s4211_s28 + $0x28] sm:$0xff] }
 0x3dd   : > { %3558 = vmatmul.mubr.msk.bf16.gmra.mrb[160].mxu0 %vm1247_vm3, %v2521_v39 }
 0x438   : > { %v2652_v53 = vpop.f32.mrb[100].mxu0 }
 0x439   : > { %v2855_v25 = vmul.f32 %v5087_v31, %v2652_v53  ;;  %v2654_v3 = vpop.f32.mrb[101].mxu0 }
 0x43a   : > { %v2856_v56 = vmul.f32 %v5090_v48, %v2654_v3  ;;  %v2656_v36 = vpop.f32.mrb[102].mxu0 }
 0x43b   : > { %v2931_v59 = vadd.f32 %v5092_v51, %v2855_v25  ;;  %v2857_v54 = vmul.f32 %v5087_v31, %v2656_v36  ;;  %v2658_v1 = vpop.f32.mrb[103].mxu0  ;;  %v3005_v25 = vunpack.c.l.bf16 %v2816_v38 }
 0x43c   : > { %v2932_v7 = vadd.f32 %v5095_v52, %v2856_v56  ;;  %v2858_v58 = vmul.f32 %v5090_v48, %v2658_v1  ;;  %v2817_v1 = vld [vmem:[%s4211_s28 + $0x30] sm:$0xff] }
 0x43d   : > { %v3059_v30 = vadd.f32 %v2995_v55, %v2931_v59  ;;  %v2933_v50 = vadd.f32 %v5092_v51, %v2857_v54 }
 0x43e   : > { %v3060_v23 = vadd.f32 %v2996_v10, %v2932_v7  ;;  %v2934_v24 = vadd.f32 %v5095_v52, %v2858_v58  ;;  %v3006_v10 = vunpack.c.h.bf16 %v2816_v38 }
 0x43f   : > { %v3123_v8 = vmax.f32 %v3059_v30, 0.0  ;;  %v3061_v33 = vadd.f32 %v2997_v57, %v2933_v50 }
 0x440   : > { %v3124_v46 = vmax.f32 %v3060_v23, 0.0  ;;  %v3062_v18 = vadd.f32 %v2998_v12, %v2934_v24  ;;  %v2662_v40 = vpop.f32.mrb[104].mxu0  ;;  %v2818_v23 = vld [vmem:[%s4211_s28 + $0x38] sm:$0xff] }
 0x441   : > { %3187 = vst [vmem:[%s5110_s20] sm:$0xff] %v3123_v8  ;;  %v3125_v2 = vmax.f32 %v3061_v33, 0.0  ;;  %v2859_v19 = vmul.f32 %v5087_v31, %v2662_v40  ;;  %v2664_v43 = vpop.f32.mrb[105].mxu0  ;;  %v3007_v8 = vunpack.c.l.bf16 %v2817_v1  ;;  %v3008_v40 = vunpack.c.h.bf16 %v2817_v1 }
 0x442   : > { %3188 = vst [vmem:[%s5110_s20 + $0x8] sm:$0xff] %v3124_v46  ;;  %v3126_v9 = vmax.f32 %v3062_v18, 0.0  ;;  %v2860_v4 = vmul.f32 %v5090_v48, %v2664_v43  ;;  %v2666_v15 = vpop.f32.mrb[106].mxu0 }
 0x443   : > { %3189 = vst [vmem:[%s5110_s20 + $0x10] sm:$0xff] %v3125_v2  ;;  %v2935_v20 = vadd.f32 %v5092_v51, %v2859_v19  ;;  %v2861_v49 = vmul.f32 %v5087_v31, %v2666_v15  ;;  %v2668_v13 = vpop.f32.mrb[107].mxu0 }
 0x444   : > { %3190 = vst [vmem:[%s5110_s20 + $0x18] sm:$0xff] %v3126_v9  ;;  %v2936_v45 = vadd.f32 %v5095_v52, %v2860_v4  ;;  %v2862_v17 = vmul.f32 %v5090_v48, %v2668_v13  ;;  %v2819_v13 = vld [vmem:[%s4211_s28 + $0x40] sm:$0xff] }
 0x445   : > { %v3063_v63 = vadd.f32 %v2999_v60, %v2935_v20  ;;  %v2937_v27 = vadd.f32 %v5092_v51, %v2861_v49  ;;  %v3009_v60 = vunpack.c.l.bf16 %v2818_v23 }
 0x446   : > { %v3064_v16 = vadd.f32 %v3000_v11, %v2936_v45  ;;  %v2938_v14 = vadd.f32 %v5095_v52, %v2862_v17  ;;  %v3010_v11 = vunpack.c.h.bf16 %v2818_v23 }
 0x447   : > { %v3127_v29 = vmax.f32 %v3063_v63, 0.0  ;;  %v3065_v34 = vadd.f32 %v3001_v0, %v2937_v27 }
 0x448   : > { %v3128_v35 = vmax.f32 %v3064_v16, 0.0  ;;  %v3066_v37 = vadd.f32 %v3002_v22, %v2938_v14  ;;  %v2672_v26 = vpop.f32.mrb[108].mxu0  ;;  %v2820_v16 = vld [vmem:[%s4211_s28 + $0x48] sm:$0xff] }
 0x449   : > { %3191 = vst [vmem:[%s5110_s20 + $0x20] sm:$0xff] %v3127_v29  ;;  %v3129_v39 = vmax.f32 %v3065_v34, 0.0  ;;  %v2863_v42 = vmul.f32 %v5087_v31, %v2672_v26  ;;  %v2674_v21 = vpop.f32.mrb[109].mxu0  ;;  %v3011_v29 = vunpack.c.l.bf16 %v2819_v13  ;;  %v3012_v26 = vunpack.c.h.bf16 %v2819_v13 }
 0x44a   : > { %3192 = vst [vmem:[%s5110_s20 + $0x28] sm:$0xff] %v3128_v35  ;;  %v3130_v41 = vmax.f32 %v3066_v37, 0.0  ;;  %v2864_v47 = vmul.f32 %v5090_v48, %v2674_v21  ;;  %v2676_v62 = vpop.f32.mrb[110].mxu0 }
 0x44b   : > { %3193 = vst [vmem:[%s5110_s20 + $0x30] sm:$0xff] %v3129_v39  ;;  %v2939_v53 = vadd.f32 %v5092_v51, %v2863_v42  ;;  %v2865_v5 = vmul.f32 %v5087_v31, %v2676_v62  ;;  %v2678_v55 = vpop.f32.mrb[111].mxu0 }
 0x44c   : > { %3194 = vst [vmem:[%s5110_s20 + $0x38] sm:$0xff] %v3130_v41  ;;  %v2940_v3 = vadd.f32 %v5095_v52, %v2864_v47  ;;  %v2866_v56 = vmul.f32 %v5090_v48, %v2678_v55  ;;  %v2821_v55 = vld [vmem:[%s4211_s28 + $0x50] sm:$0xff] }
 0x44d   : > { %v3067_v36 = vadd.f32 %v3003_v44, %v2939_v53  ;;  %v2941_v59 = vadd.f32 %v5092_v51, %v2865_v5  ;;  %v3013_v44 = vunpack.c.l.bf16 %v2820_v16 }
 0x44e   : > { %v3068_v54 = vadd.f32 %v3004_v6, %v2940_v3  ;;  %v2942_v57 = vadd.f32 %v5095_v52, %v2866_v56  ;;  %v3014_v6 = vunpack.c.h.bf16 %v2820_v16 }
 0x44f   : > { %v3131_v7 = vmax.f32 %v3067_v36, 0.0  ;;  %v3069_v58 = vadd.f32 %v3005_v25, %v2941_v59 }
 0x450   : > { %v3132_v12 = vmax.f32 %v3068_v54, 0.0  ;;  %v3070_v30 = vadd.f32 %v3006_v10, %v2942_v57  ;;  %v2682_v50 = vpop.f32.mrb[112].mxu0  ;;  %v2822_v54 = vld [vmem:[%s4211_s28 + $0x58] sm:$0xff] }
 0x451   : > { %3195 = vst [vmem:[%s5110_s20 + $0x40] sm:$0xff] %v3131_v7  ;;  %v3133_v24 = vmax.f32 %v3069_v58, 0.0  ;;  %v2867_v32 = vmul.f32 %v5087_v31, %v2682_v50  ;;  %v2684_v33 = vpop.f32.mrb[113].mxu0  ;;  %v3015_v7 = vunpack.c.l.bf16 %v2821_v55  ;;  %v3016_v50 = vunpack.c.h.bf16 %v2821_v55 }
 0x452   : > { %3196 = vst [vmem:[%s5110_s20 + $0x48] sm:$0xff] %v3132_v12  ;;  %v3134_v46 = vmax.f32 %v3070_v30, 0.0  ;;  %v2868_v18 = vmul.f32 %v5090_v48, %v2684_v33  ;;  %v2686_v61 = vpop.f32.mrb[114].mxu0 }
 0x453   : > { %3197 = vst [vmem:[%s5110_s20 + $0x50] sm:$0xff] %v3133_v24  ;;  %v2943_v2 = vadd.f32 %v5092_v51, %v2867_v32  ;;  %v2869_v19 = vmul.f32 %v5087_v31, %v2686_v61  ;;  %v2688_v43 = vpop.f32.mrb[115].mxu0 }
 0x454   : > { %3198 = vst [vmem:[%s5110_s20 + $0x58] sm:$0xff] %v3134_v46  ;;  %v2944_v9 = vadd.f32 %v5095_v52, %v2868_v18  ;;  %v2870_v4 = vmul.f32 %v5090_v48, %v2688_v43  ;;  %v2823_v43 = vld [vmem:[%s4211_s28 + $0x60] sm:$0xff] }
 0x455   : > { %v3071_v15 = vadd.f32 %v3007_v8, %v2943_v2  ;;  %v2945_v20 = vadd.f32 %v5092_v51, %v2869_v19  ;;  %v3017_v8 = vunpack.c.l.bf16 %v2822_v54 }
 0x456   : > { %v3072_v49 = vadd.f32 %v3008_v40, %v2944_v9  ;;  %v2946_v0 = vadd.f32 %v5095_v52, %v2870_v4  ;;  %v3018_v40 = vunpack.c.h.bf16 %v2822_v54 }
 0x457   : > { %v3135_v45 = vmax.f32 %v3071_v15, 0.0  ;;  %v3073_v17 = vadd.f32 %v3009_v60, %v2945_v20 }
 0x458   : > { %v3136_v22 = vmax.f32 %v3072_v49, 0.0  ;;  %v3074_v63 = vadd.f32 %v3010_v11, %v2946_v0  ;;  %v2692_v27 = vpop.f32.mrb[116].mxu0  ;;  %v2824_v49 = vld [vmem:[%s4211_s28 + $0x68] sm:$0xff] }
 0x459   : > { %3199 = vst [vmem:[%s5110_s20 + $0x60] sm:$0xff] %v3135_v45  ;;  %v3137_v14 = vmax.f32 %v3073_v17, 0.0  ;;  %v2871_v28 = vmul.f32 %v5087_v31, %v2692_v27  ;;  %v2694_v34 = vpop.f32.mrb[117].mxu0  ;;  %v3019_v45 = vunpack.c.l.bf16 %v2823_v43  ;;  %v3020_v27 = vunpack.c.h.bf16 %v2823_v43 }
 0x45a   : > { %3200 = vst [vmem:[%s5110_s20 + $0x68] sm:$0xff] %v3136_v22  ;;  %v3138_v35 = vmax.f32 %v3074_v63, 0.0  ;;  %v2872_v37 = vmul.f32 %v5090_v48, %v2694_v34  ;;  %v2696_v38 = vpop.f32.mrb[118].mxu0 }
 0x45b   : > { %3201 = vst [vmem:[%s5110_s20 + $0x70] sm:$0xff] %v3137_v14  ;;  %v2947_v39 = vadd.f32 %v5092_v51, %v2871_v28  ;;  %v2873_v42 = vmul.f32 %v5087_v31, %v2696_v38  ;;  %v2698_v21 = vpop.f32.mrb[119].mxu0 }
 0x45c   : > { %3202 = vst [vmem:[%s5110_s20 + $0x78] sm:$0xff] %v3138_v35  ;;  %v2948_v41 = vadd.f32 %v5095_v52, %v2872_v37  ;;  %v2874_v47 = vmul.f32 %v5090_v48, %v2698_v21  ;;  %v2825_v21 = vld [vmem:[%s4211_s28 + $0x70] sm:$0xff] }
 0x45d   : > { %v3075_v62 = vadd.f32 %v3011_v29, %v2947_v39  ;;  %v2949_v53 = vadd.f32 %v5092_v51, %v2873_v42  ;;  %v3021_v29 = vunpack.c.l.bf16 %v2824_v49 }
 0x45e   : > { %v3076_v5 = vadd.f32 %v3012_v26, %v2948_v41  ;;  %v2950_v25 = vadd.f32 %v5095_v52, %v2874_v47  ;;  %v3022_v26 = vunpack.c.h.bf16 %v2824_v49 }
 0x45f   : > { %v3139_v3 = vmax.f32 %v3075_v62, 0.0  ;;  %v3077_v56 = vadd.f32 %v3013_v44, %v2949_v53 }
 0x460   : > { %v3140_v10 = vmax.f32 %v3076_v5, 0.0  ;;  %v3078_v36 = vadd.f32 %v3014_v6, %v2950_v25  ;;  %v2702_v59 = vpop.f32.mrb[120].mxu0  ;;  %v2826_v5 = vld [vmem:[%s4211_s28 + $0x78] sm:$0xff] }
 0x461   : > { %3203 = vst [vmem:[%s5110_s20 + $0x80] sm:$0xff] %v3139_v3  ;;  %v3141_v57 = vmax.f32 %v3077_v56, 0.0  ;;  %v2875_v1 = vmul.f32 %v5087_v31, %v2702_v59  ;;  %v2704_v58 = vpop.f32.mrb[121].mxu0  ;;  %v3023_v3 = vunpack.c.l.bf16 %v2825_v21  ;;  %v3024_v59 = vunpack.c.h.bf16 %v2825_v21 }
 0x462   : > { %3204 = vst [vmem:[%s5110_s20 + $0x88] sm:$0xff] %v3140_v10  ;;  %v3142_v12 = vmax.f32 %v3078_v36, 0.0  ;;  %v2876_v30 = vmul.f32 %v5090_v48, %v2704_v58  ;;  %v2706_v23 = vpop.f32.mrb[122].mxu0 }
 0x463   : > { %3205 = vst [vmem:[%s5110_s20 + $0x90] sm:$0xff] %v3141_v57  ;;  %v2951_v24 = vadd.f32 %v5092_v51, %v2875_v1  ;;  %v2877_v32 = vmul.f32 %v5087_v31, %v2706_v23  ;;  %v2708_v33 = vpop.f32.mrb[123].mxu0 }
 0x464   : > { %3206 = vst [vmem:[%s5110_s20 + $0x98] sm:$0xff] %v3142_v12  ;;  %v2952_v46 = vadd.f32 %v5095_v52, %v2876_v30  ;;  %v2878_v18 = vmul.f32 %v5090_v48, %v2708_v33  ;;  %v2827_v33 = vld [vmem:[%s4211_s28 + $0x80] sm:$0xff] }
 0x465   : > { %v3079_v61 = vadd.f32 %v3015_v7, %v2951_v24  ;;  %v2953_v2 = vadd.f32 %v5092_v51, %v2877_v32  ;;  %v3025_v7 = vunpack.c.l.bf16 %v2826_v5 }
 0x466   : > { %v3080_v19 = vadd.f32 %v3016_v50, %v2952_v46  ;;  %v2954_v60 = vadd.f32 %v5095_v52, %v2878_v18  ;;  %v3026_v50 = vunpack.c.h.bf16 %v2826_v5 }
 0x467   : > { %v3143_v9 = vmax.f32 %v3079_v61, 0.0  ;;  %v3081_v4 = vadd.f32 %v3017_v8, %v2953_v2 }
 0x468   : > { %v3144_v11 = vmax.f32 %v3080_v19, 0.0  ;;  %v3082_v15 = vadd.f32 %v3018_v40, %v2954_v60  ;;  %v2712_v20 = vpop.f32.mrb[124].mxu0  ;;  %v2828_v19 = vld [vmem:[%s4211_s28 + $0x88] sm:$0xff] }
 0x469   : > { %3207 = vst [vmem:[%s5110_s20 + $0xa0] sm:$0xff] %v3143_v9  ;;  %v3145_v0 = vmax.f32 %v3081_v4, 0.0  ;;  %v2879_v13 = vmul.f32 %v5087_v31, %v2712_v20  ;;  %v2714_v17 = vpop.f32.mrb[125].mxu0  ;;  %v3027_v9 = vunpack.c.l.bf16 %v2827_v33  ;;  %v3028_v20 = vunpack.c.h.bf16 %v2827_v33 }
 0x46a   : > { %3208 = vst [vmem:[%s5110_s20 + $0xa8] sm:$0xff] %v3144_v11  ;;  %v3146_v22 = vmax.f32 %v3082_v15, 0.0  ;;  %v2880_v63 = vmul.f32 %v5090_v48, %v2714_v17  ;;  %v2716_v16 = vpop.f32.mrb[126].mxu0 }
 0x46b   : > { %3209 = vst [vmem:[%s5110_s20 + $0xb0] sm:$0xff] %v3145_v0  ;;  %v2955_v14 = vadd.f32 %v5092_v51, %v2879_v13  ;;  %v2881_v28 = vmul.f32 %v5087_v31, %v2716_v16  ;;  %v2718_v34 = vpop.f32.mrb[127].mxu0 }
 0x46c   : > { %3210 = vst [vmem:[%s5110_s20 + $0xb8] sm:$0xff] %v3146_v22  ;;  %v2956_v35 = vadd.f32 %v5095_v52, %v2880_v63  ;;  %v2882_v37 = vmul.f32 %v5090_v48, %v2718_v34  ;;  %v2829_v34 = vld [vmem:[%s4211_s28 + $0x90] sm:$0xff] }
 0x46d   : > { %v3083_v38 = vadd.f32 %v3019_v45, %v2955_v14  ;;  %v2957_v39 = vadd.f32 %v5092_v51, %v2881_v28  ;;  %v3029_v45 = vunpack.c.l.bf16 %v2828_v19 }
 0x46e   : > { %v3084_v42 = vadd.f32 %v3020_v27, %v2956_v35  ;;  %v2958_v44 = vadd.f32 %v5095_v52, %v2882_v37  ;;  %v3030_v27 = vunpack.c.h.bf16 %v2828_v19 }
 0x46f   : > { %v3147_v41 = vmax.f32 %v3083_v38, 0.0  ;;  %v3085_v47 = vadd.f32 %v3021_v29, %v2957_v39 }
 0x470   : > { %v3148_v6 = vmax.f32 %v3084_v42, 0.0  ;;  %v3086_v62 = vadd.f32 %v3022_v26, %v2958_v44  ;;  %v2722_v53 = vpop.f32.mrb[128].mxu0  ;;  %v2830_v42 = vld [vmem:[%s4211_s28 + $0x98] sm:$0xff] }
 0x471   : > { %3211 = vst [vmem:[%s5110_s20 + $0xc0] sm:$0xff] %v3147_v41  ;;  %v3149_v25 = vmax.f32 %v3085_v47, 0.0  ;;  %v2883_v55 = vmul.f32 %v5087_v31, %v2722_v53  ;;  %v2724_v56 = vpop.f32.mrb[129].mxu0  ;;  %v3031_v41 = vunpack.c.l.bf16 %v2829_v34  ;;  %v3032_v53 = vunpack.c.h.bf16 %v2829_v34 }
 0x472   : > { %3212 = vst [vmem:[%s5110_s20 + $0xc8] sm:$0xff] %v3148_v6  ;;  %v3150_v10 = vmax.f32 %v3086_v62, 0.0  ;;  %v2884_v36 = vmul.f32 %v5090_v48, %v2724_v56  ;;  %v2726_v54 = vpop.f32.mrb[130].mxu0 }
 0x473   : > { %3213 = vst [vmem:[%s5110_s20 + $0xd0] sm:$0xff] %v3149_v25  ;;  %v2959_v57 = vadd.f32 %v5092_v51, %v2883_v55  ;;  %v2885_v1 = vmul.f32 %v5087_v31, %v2726_v54  ;;  %v2728_v58 = vpop.f32.mrb[131].mxu0 }
 0x474   : > { %3214 = vst [vmem:[%s5110_s20 + $0xd8] sm:$0xff] %v3150_v10  ;;  %v2960_v12 = vadd.f32 %v5095_v52, %v2884_v36  ;;  %v2886_v30 = vmul.f32 %v5090_v48, %v2728_v58  ;;  %v2831_v58 = vld [vmem:[%s4211_s28 + $0xa0] sm:$0xff] }
 0x475   : > { %v3087_v23 = vadd.f32 %v3023_v3, %v2959_v57  ;;  %v2961_v24 = vadd.f32 %v5092_v51, %v2885_v1  ;;  %v3033_v3 = vunpack.c.l.bf16 %v2830_v42 }
 0x476   : > { %v3088_v32 = vadd.f32 %v3024_v59, %v2960_v12  ;;  %v2962_v8 = vadd.f32 %v5095_v52, %v2886_v30  ;;  %v3034_v59 = vunpack.c.h.bf16 %v2830_v42 }
 0x477   : > { %v3151_v46 = vmax.f32 %v3087_v23, 0.0  ;;  %v3089_v18 = vadd.f32 %v3025_v7, %v2961_v24 }
 0x478   : > { %v3152_v40 = vmax.f32 %v3088_v32, 0.0  ;;  %v3090_v61 = vadd.f32 %v3026_v50, %v2962_v8  ;;  %v2732_v2 = vpop.f32.mrb[132].mxu0  ;;  %v2832_v32 = vld [vmem:[%s4211_s28 + $0xa8] sm:$0xff] }
 0x479   : > { %3215 = vst [vmem:[%s5110_s20 + $0xe0] sm:$0xff] %v3151_v46  ;;  %v3153_v60 = vmax.f32 %v3089_v18, 0.0  ;;  %v2887_v43 = vmul.f32 %v5087_v31, %v2732_v2  ;;  %v2734_v4 = vpop.f32.mrb[133].mxu0  ;;  %v3035_v46 = vunpack.c.l.bf16 %v2831_v58  ;;  %v3036_v2 = vunpack.c.h.bf16 %v2831_v58 }
 0x47a   : > { %3216 = vst [vmem:[%s5110_s20 + $0xe8] sm:$0xff] %v3152_v40  ;;  %v3154_v11 = vmax.f32 %v3090_v61, 0.0  ;;  %v2888_v15 = vmul.f32 %v5090_v48, %v2734_v4  ;;  %v2736_v49 = vpop.f32.mrb[134].mxu0 }
 0x47b   : > { %3217 = vst [vmem:[%s5110_s20 + $0xf0] sm:$0xff] %v3153_v60  ;;  %v2963_v0 = vadd.f32 %v5092_v51, %v2887_v43  ;;  %v2889_v13 = vmul.f32 %v5087_v31, %v2736_v49  ;;  %v2738_v17 = vpop.f32.mrb[135].mxu0 }
 0x47c   : > { %3218 = vst [vmem:[%s5110_s20 + $0xf8] sm:$0xff] %v3154_v11  ;;  %v2964_v22 = vadd.f32 %v5095_v52, %v2888_v15  ;;  %v2890_v63 = vmul.f32 %v5090_v48, %v2738_v17  ;;  %v2833_v17 = vld [vmem:[%s4211_s28 + $0xb0] sm:$0xff] }
 0x47d   : > { %v3091_v16 = vadd.f32 %v3027_v9, %v2963_v0  ;;  %v2965_v14 = vadd.f32 %v5092_v51, %v2889_v13  ;;  %v3037_v9 = vunpack.c.l.bf16 %v2832_v32 }
 0x47e   : > { %v3092_v28 = vadd.f32 %v3028_v20, %v2964_v22  ;;  %v2966_v29 = vadd.f32 %v5095_v52, %v2890_v63  ;;  %v3038_v20 = vunpack.c.h.bf16 %v2832_v32 }
 0x47f   : > { %v3155_v35 = vmax.f32 %v3091_v16, 0.0  ;;  %v3093_v37 = vadd.f32 %v3029_v45, %v2965_v14 }
 0x480   : > { %v3156_v26 = vmax.f32 %v3092_v28, 0.0  ;;  %v3094_v38 = vadd.f32 %v3030_v27, %v2966_v29  ;;  %v2742_v39 = vpop.f32.mrb[136].mxu0  ;;  %v2834_v28 = vld [vmem:[%s4211_s28 + $0xb8] sm:$0xff] }
 0x481   : > { %3219 = vst [vmem:[%s5110_s20 + $0x100] sm:$0xff] %v3155_v35  ;;  %v3157_v44 = vmax.f32 %v3093_v37, 0.0  ;;  %v2891_v21 = vmul.f32 %v5087_v31, %v2742_v39  ;;  %v2744_v47 = vpop.f32.mrb[137].mxu0  ;;  %v3039_v35 = vunpack.c.l.bf16 %v2833_v17  ;;  %v3040_v39 = vunpack.c.h.bf16 %v2833_v17 }
 0x482   : > { %3220 = vst [vmem:[%s5110_s20 + $0x108] sm:$0xff] %v3156_v26  ;;  %v3158_v6 = vmax.f32 %v3094_v38, 0.0  ;;  %v2892_v62 = vmul.f32 %v5090_v48, %v2744_v47  ;;  %v2746_v5 = vpop.f32.mrb[138].mxu0 }
 0x483   : > { %3221 = vst [vmem:[%s5110_s20 + $0x110] sm:$0xff] %v3157_v44  ;;  %v2967_v25 = vadd.f32 %v5092_v51, %v2891_v21  ;;  %v2893_v55 = vmul.f32 %v5087_v31, %v2746_v5  ;;  %v2748_v56 = vpop.f32.mrb[139].mxu0 }
 0x484   : > { %3222 = vst [vmem:[%s5110_s20 + $0x118] sm:$0xff] %v3158_v6  ;;  %v2968_v10 = vadd.f32 %v5095_v52, %v2892_v62  ;;  %v2894_v36 = vmul.f32 %v5090_v48, %v2748_v56  ;;  %v2835_v56 = vld [vmem:[%s4211_s28 + $0xc0] sm:$0xff] }
 0x485   : > { %v3095_v54 = vadd.f32 %v3031_v41, %v2967_v25  ;;  %v2969_v57 = vadd.f32 %v5092_v51, %v2893_v55  ;;  %v3041_v41 = vunpack.c.l.bf16 %v2834_v28 }
 0x486   : > { %v3096_v1 = vadd.f32 %v3032_v53, %v2968_v10  ;;  %v2970_v7 = vadd.f32 %v5095_v52, %v2894_v36  ;;  %v3042_v53 = vunpack.c.h.bf16 %v2834_v28 }
 0x487   : > { %v3159_v12 = vmax.f32 %v3095_v54, 0.0  ;;  %v3097_v30 = vadd.f32 %v3033_v3, %v2969_v57 }
 0x488   : > { %v3160_v50 = vmax.f32 %v3096_v1, 0.0  ;;  %v3098_v23 = vadd.f32 %v3034_v59, %v2970_v7  ;;  %v2752_v24 = vpop.f32.mrb[140].mxu0  ;;  %v2836_v1 = vld [vmem:[%s4211_s28 + $0xc8] sm:$0xff] }
 0x489   : > { %3223 = vst [vmem:[%s5110_s20 + $0x120] sm:$0xff] %v3159_v12  ;;  %v3161_v8 = vmax.f32 %v3097_v30, 0.0  ;;  %v2895_v33 = vmul.f32 %v5087_v31, %v2752_v24  ;;  %v2754_v18 = vpop.f32.mrb[141].mxu0  ;;  %v3043_v12 = vunpack.c.l.bf16 %v2835_v56  ;;  %v3044_v24 = vunpack.c.h.bf16 %v2835_v56 }
 0x48a   : > { %3224 = vst [vmem:[%s5110_s20 + $0x128] sm:$0xff] %v3160_v50  ;;  %v3162_v40 = vmax.f32 %v3098_v23, 0.0  ;;  %v2896_v61 = vmul.f32 %v5090_v48, %v2754_v18  ;;  %v2756_v19 = vpop.f32.mrb[142].mxu0 }
 0x48b   : > { %3225 = vst [vmem:[%s5110_s20 + $0x130] sm:$0xff] %v3161_v8  ;;  %v2971_v60 = vadd.f32 %v5092_v51, %v2895_v33  ;;  %v2897_v43 = vmul.f32 %v5087_v31, %v2756_v19  ;;  %v2758_v4 = vpop.f32.mrb[143].mxu0 }
 0x48c   : > { %3226 = vst [vmem:[%s5110_s20 + $0x138] sm:$0xff] %v3162_v40  ;;  %v2972_v11 = vadd.f32 %v5095_v52, %v2896_v61  ;;  %v2898_v15 = vmul.f32 %v5090_v48, %v2758_v4  ;;  %v2837_v4 = vld [vmem:[%s4211_s28 + $0xd0] sm:$0xff] }
 0x48d   : > { %v3099_v49 = vadd.f32 %v3035_v46, %v2971_v60  ;;  %v2973_v0 = vadd.f32 %v5092_v51, %v2897_v43  ;;  %v3045_v46 = vunpack.c.l.bf16 %v2836_v1 }
 0x48e   : > { %v3100_v13 = vadd.f32 %v3036_v2, %v2972_v11  ;;  %v2974_v45 = vadd.f32 %v5095_v52, %v2898_v15  ;;  %v3046_v2 = vunpack.c.h.bf16 %v2836_v1 }
 0x48f   : > { %v3163_v22 = vmax.f32 %v3099_v49, 0.0  ;;  %v3101_v63 = vadd.f32 %v3037_v9, %v2973_v0 }
 0x490   : > { %v3164_v27 = vmax.f32 %v3100_v13, 0.0  ;;  %v3102_v16 = vadd.f32 %v3038_v20, %v2974_v45  ;;  %v2762_v14 = vpop.f32.mrb[144].mxu0  ;;  %v2838_v13 = vld [vmem:[%s4211_s28 + $0xd8] sm:$0xff] }
 0x491   : > { %3227 = vst [vmem:[%s5110_s20 + $0x140] sm:$0xff] %v3163_v22  ;;  %v3165_v29 = vmax.f32 %v3101_v63, 0.0  ;;  %v2899_v34 = vmul.f32 %v5087_v31, %v2762_v14  ;;  %v2764_v37 = vpop.f32.mrb[145].mxu0  ;;  %v3047_v22 = vunpack.c.l.bf16 %v2837_v4  ;;  %v3048_v14 = vunpack.c.h.bf16 %v2837_v4 }
 0x492   : > { %3228 = vst [vmem:[%s5110_s20 + $0x148] sm:$0xff] %v3164_v27  ;;  %v3166_v26 = vmax.f32 %v3102_v16, 0.0  ;;  %v2900_v38 = vmul.f32 %v5090_v48, %v2764_v37  ;;  %v2766_v42 = vpop.f32.mrb[146].mxu0 }
 0x493   : > { %3229 = vst [vmem:[%s5110_s20 + $0x150] sm:$0xff] %v3165_v29  ;;  %v2975_v44 = vadd.f32 %v5092_v51, %v2899_v34  ;;  %v2901_v21 = vmul.f32 %v5087_v31, %v2766_v42  ;;  %v2768_v47 = vpop.f32.mrb[147].mxu0 }
 0x494   : > { %3230 = vst [vmem:[%s5110_s20 + $0x158] sm:$0xff] %v3166_v26  ;;  %v2976_v6 = vadd.f32 %v5095_v52, %v2900_v38  ;;  %v2902_v62 = vmul.f32 %v5090_v48, %v2768_v47  ;;  %v2839_v47 = vld [vmem:[%s4211_s28 + $0xe0] sm:$0xff] }
 0x495   : > { %v3103_v5 = vadd.f32 %v3039_v35, %v2975_v44  ;;  %v2977_v25 = vadd.f32 %v5092_v51, %v2901_v21  ;;  %v3049_v35 = vunpack.c.l.bf16 %v2838_v13 }
 0x496   : > { %v3104_v55 = vadd.f32 %v3040_v39, %v2976_v6  ;;  %v2978_v3 = vadd.f32 %v5095_v52, %v2902_v62  ;;  %v3050_v39 = vunpack.c.h.bf16 %v2838_v13 }
 0x497   : > { %v3167_v10 = vmax.f32 %v3103_v5, 0.0  ;;  %v3105_v36 = vadd.f32 %v3041_v41, %v2977_v25 }
 0x498   : > { %v3168_v59 = vmax.f32 %v3104_v55, 0.0  ;;  %v3106_v54 = vadd.f32 %v3042_v53, %v2978_v3  ;;  %v2772_v57 = vpop.f32.mrb[148].mxu0  ;;  %v2840_v55 = vld [vmem:[%s4211_s28 + $0xe8] sm:$0xff] }
 0x499   : > { %3231 = vst [vmem:[%s5110_s20 + $0x160] sm:$0xff] %v3167_v10  ;;  %v3169_v7 = vmax.f32 %v3105_v36, 0.0  ;;  %v2903_v58 = vmul.f32 %v5087_v31, %v2772_v57  ;;  %v2774_v30 = vpop.f32.mrb[149].mxu0  ;;  %v3051_v10 = vunpack.c.l.bf16 %v2839_v47  ;;  %v3052_v57 = vunpack.c.h.bf16 %v2839_v47 }
 0x49a   : > { %3232 = vst [vmem:[%s5110_s20 + $0x168] sm:$0xff] %v3168_v59  ;;  %v3170_v50 = vmax.f32 %v3106_v54, 0.0  ;;  %v2904_v23 = vmul.f32 %v5090_v48, %v2774_v30  ;;  %v2776_v32 = vpop.f32.mrb[150].mxu0 }
 0x49b   : > { %3233 = vst [vmem:[%s5110_s20 + $0x170] sm:$0xff] %v3169_v7  ;;  %v2979_v8 = vadd.f32 %v5092_v51, %v2903_v58  ;;  %v2905_v33 = vmul.f32 %v5087_v31, %v2776_v32  ;;  %v2778_v18 = vpop.f32.mrb[151].mxu0 }
 0x49c   : > { %3234 = vst [vmem:[%s5110_s20 + $0x178] sm:$0xff] %v3170_v50  ;;  %v2980_v40 = vadd.f32 %v5095_v52, %v2904_v23  ;;  %v2906_v61 = vmul.f32 %v5090_v48, %v2778_v18  ;;  %v2841_v18 = vld [vmem:[%s4211_s28 + $0xf0] sm:$0xff] }
 0x49d   : > { %v3107_v19 = vadd.f32 %v3043_v12, %v2979_v8  ;;  %v2981_v60 = vadd.f32 %v5092_v51, %v2905_v33  ;;  %v3053_v12 = vunpack.c.l.bf16 %v2840_v55 }
 0x49e   : > { %v3108_v43 = vadd.f32 %v3044_v24, %v2980_v40  ;;  %v2982_v9 = vadd.f32 %v5095_v52, %v2906_v61  ;;  %v3054_v24 = vunpack.c.h.bf16 %v2840_v55 }
 0x49f   : > { %v3171_v11 = vmax.f32 %v3107_v19, 0.0  ;;  %v3109_v15 = vadd.f32 %v3045_v46, %v2981_v60 }
 0x4a0   : > { %v3172_v20 = vmax.f32 %v3108_v43, 0.0  ;;  %v3110_v49 = vadd.f32 %v3046_v2, %v2982_v9  ;;  %v2782_v0 = vpop.f32.mrb[152].mxu0  ;;  %v2842_v43 = vld [vmem:[%s4211_s28 + $0xf8] sm:$0xff]  ;;  %s3565_s28 = sshll.u32 %s4054_s16, 13  ;;  %s5335_s16 = scalar_lea.sflag [#allocation4], %s364_s22 }
 0x4a1   : > { %3235 = vst [vmem:[%s5110_s20 + $0x180] sm:$0xff] %v3171_v11  ;;  %v3173_v45 = vmax.f32 %v3109_v15, 0.0  ;;  %v2907_v17 = vmul.f32 %v5087_v31, %v2782_v0  ;;  %v2784_v63 = vpop.f32.mrb[153].mxu0  ;;  %v3055_v11 = vunpack.c.l.bf16 %v2841_v18  ;;  %v3056_v0 = vunpack.c.h.bf16 %v2841_v18  ;;  %s5326_s11 = scalar_lea.hbm %s5391_s10, %s3565_s28 }
 0x4a2   : > { %3236 = vst [vmem:[%s5110_s20 + $0x188] sm:$0xff] %v3172_v20  ;;  %v3174_v27 = vmax.f32 %v3110_v49, 0.0  ;;  %v2908_v16 = vmul.f32 %v5090_v48, %v2784_v63  ;;  %v2786_v28 = vpop.f32.mrb[154].mxu0 }
 0x4a3   : > { %3237 = vst [vmem:[%s5110_s20 + $0x190] sm:$0xff] %v3173_v45  ;;  %v2983_v29 = vadd.f32 %v5092_v51, %v2907_v17  ;;  %v2909_v34 = vmul.f32 %v5087_v31, %v2786_v28  ;;  %v2788_v37 = vpop.f32.mrb[155].mxu0 }
 0x4a4   : > { %3238 = vst [vmem:[%s5110_s20 + $0x198] sm:$0xff] %v3174_v27  ;;  %v2984_v26 = vadd.f32 %v5095_v52, %v2908_v16  ;;  %v2910_v38 = vmul.f32 %v5090_v48, %v2788_v37 }
 0x4a5   : > { %v3111_v42 = vadd.f32 %v3047_v22, %v2983_v29  ;;  %v2985_v44 = vadd.f32 %v5092_v51, %v2909_v34  ;;  %v3057_v22 = vunpack.c.l.bf16 %v2842_v43 }
 0x4a6   : > { %v3112_v21 = vadd.f32 %v3048_v14, %v2984_v26  ;;  %v2986_v41 = vadd.f32 %v5095_v52, %v2910_v38  ;;  %v3058_v14 = vunpack.c.h.bf16 %v2842_v43 }
 0x4a7   : > { %v3175_v6 = vmax.f32 %v3111_v42, 0.0  ;;  %v3113_v62 = vadd.f32 %v3049_v35, %v2985_v44 }
 0x4a8   : > { %v3176_v53 = vmax.f32 %v3112_v21, 0.0  ;;  %v3114_v5 = vadd.f32 %v3050_v39, %v2986_v41  ;;  %v2792_v25 = vpop.f32.mrb[156].mxu0 }
 0x4a9   : > { %3239 = vst [vmem:[%s5110_s20 + $0x1a0] sm:$0xff] %v3175_v6  ;;  %v3177_v3 = vmax.f32 %v3113_v62, 0.0  ;;  %v2911_v56 = vmul.f32 %v5087_v31, %v2792_v25  ;;  %v2794_v36 = vpop.f32.mrb[157].mxu0 }
 0x4aa   : > { %3240 = vst [vmem:[%s5110_s20 + $0x1a8] sm:$0xff] %v3176_v53  ;;  %v3178_v59 = vmax.f32 %v3114_v5, 0.0  ;;  %v2912_v54 = vmul.f32 %v5090_v48, %v2794_v36  ;;  %v2796_v1 = vpop.f32.mrb[158].mxu0 }
 0x4ab   : > { %3241 = vst [vmem:[%s5110_s20 + $0x1b0] sm:$0xff] %v3177_v3  ;;  %v2987_v7 = vadd.f32 %v5092_v51, %v2911_v56  ;;  %v2913_v58 = vmul.f32 %v5087_v31, %v2796_v1  ;;  %v2798_v30 = vpop.f32.mrb[159].mxu0 }
 0x4ac   : > { %3242 = vst [vmem:[%s5110_s20 + $0x1b8] sm:$0xff] %v3178_v59  ;;  %v2988_v50 = vadd.f32 %v5095_v52, %v2912_v54  ;;  %v2914_v23 = vmul.f32 %v5090_v48, %v2798_v30 }
 0x4ad   : > { %v3115_v32 = vadd.f32 %v3051_v10, %v2987_v7  ;;  %v2989_v8 = vadd.f32 %v5092_v51, %v2913_v58 }
 0x4ae   : > { %v3116_v33 = vadd.f32 %v3052_v57, %v2988_v50  ;;  %v2990_v46 = vadd.f32 %v5095_v52, %v2914_v23 }
 0x4af   : > { %v3179_v40 = vmax.f32 %v3115_v32, 0.0  ;;  %v3117_v61 = vadd.f32 %v3053_v12, %v2989_v8 }
 0x4b0   : > { %v3180_v2 = vmax.f32 %v3116_v33, 0.0  ;;  %v3118_v19 = vadd.f32 %v3054_v24, %v2990_v46  ;;  %v2802_v60 = vpop.f32.mrb[160].mxu0 }
 0x4b1   : > { %3243 = vst [vmem:[%s5110_s20 + $0x1c0] sm:$0xff] %v3179_v40  ;;  %v3181_v9 = vmax.f32 %v3117_v61, 0.0  ;;  %v2915_v4 = vmul.f32 %v5087_v31, %v2802_v60  ;;  %v2804_v15 = vpop.f32.mrb[161].mxu0 }
 0x4b2   : > { %3244 = vst [vmem:[%s5110_s20 + $0x1c8] sm:$0xff] %v3180_v2  ;;  %v3182_v20 = vmax.f32 %v3118_v19, 0.0  ;;  %v2916_v49 = vmul.f32 %v5090_v48, %v2804_v15  ;;  %v2806_v13 = vpop.f32.mrb[162].mxu0 }
 0x4b3   : > { %3245 = vst [vmem:[%s5110_s20 + $0x1d0] sm:$0xff] %v3181_v9  ;;  %v2991_v45 = vadd.f32 %v5092_v51, %v2915_v4  ;;  %v2917_v17 = vmul.f32 %v5087_v31, %v2806_v13  ;;  %v2808_v63 = vpop.f32.mrb[163].mxu0 }
 0x4b4   : > { %3246 = vst [vmem:[%s5110_s20 + $0x1d8] sm:$0xff] %v3182_v20  ;;  %v2992_v27 = vadd.f32 %v5095_v52, %v2916_v49  ;;  %v2918_v16 = vmul.f32 %v5090_v48, %v2808_v63 }
 0x4b5   : > { %v3119_v28 = vadd.f32 %v3055_v11, %v2991_v45  ;;  %v2993_v29 = vadd.f32 %v5092_v51, %v2917_v17 }
 0x4b6   : > { %v3120_v34 = vadd.f32 %v3056_v0, %v2992_v27  ;;  %v2994_v35 = vadd.f32 %v5095_v52, %v2918_v16 }
 0x4b7   : > { %v3183_v31 = vmax.f32 %v3119_v28, 0.0  ;;  %v3121_v37 = vadd.f32 %v3057_v22, %v2993_v29 }
 0x4b8   : > { %v3184_v26 = vmax.f32 %v3120_v34, 0.0  ;;  %v3122_v38 = vadd.f32 %v3058_v14, %v2994_v35 }
 0x4b9   : > { %3247 = vst [vmem:[%s5110_s20 + $0x1e0] sm:$0xff] %v3183_v31  ;;  %v3185_v48 = vmax.f32 %v3121_v37, 0.0 }
 0x4ba   : > { %3248 = vst [vmem:[%s5110_s20 + $0x1e8] sm:$0xff] %v3184_v26  ;;  %v3186_v51 = vmax.f32 %v3122_v38, 0.0 }
 0x4bb   : > { %3249 = vst [vmem:[%s5110_s20 + $0x1f0] sm:$0xff] %v3185_v48 }
 0x4bc   : > { %3250 = vst [vmem:[%s5110_s20 + $0x1f8] sm:$0xff] %v3186_v51 }
 0x4bd   : > { %3997 = shalt.err (!%p3994_p5)
}
 0x4be   : > { %s3998_s22 = scalar_lea.hbm %s5326_s11, 8192  ;;  %s4002_s27 = scalar_lea.hbm %s5391_s10, 16384 }
 0x4bf   : > { %p3999_p6 = scmp.ne.s32.totalorder %s5326_s11, %s3998_s22  ;;  %p4003_p10 = scmp.lt.u32.totalorder %s5326_s11, %s5391_s10 }
 0x4c0   : > { %p4004_p11 = scmp.lt.u32.totalorder %s4002_s27, %s3998_s22  ;;  %p4006_p13 = scmp.lt.u32.totalorder %s3998_s22, %s5326_s11 }
 0x4c1   : > { %p4000_p7 = pnand %p3999_p6, %p4164_p4 }
 0x4c2   : > { %p4005_p12 = por %p4004_p11, %p4003_p10 }
 0x4c3   : > { %p4001_p9 = pneg %p4000_p7 }
 0x4c4   : > { %p4007_p0 = por %p4006_p13, %p4005_p12 }
 0x4c6   : > { %p4008_p1 = pnand %p4007_p0, %p4001_p9 }
 0x4c8   : > { %4011 = shalt.err (!%p4008_p1)
}
 0x4c9   : > { %s4067_s12 = smov 256   ;;  %s4068_s19 = smov 16  }
 0x4ca   : > { %3812 = dma.vmem_to_hbm [thread:$0]  (%p4164_p4), %s5328_s24, 8192, %s5326_s11, %s5335_s16, %s4067_s12, %s4067_s12, %s4068_s19  }
 0x4cb PF: > { %p3818_p2 = scmp.ge.s32.totalorder %s4062_s18, 2  ;;  %s3283_s21 = sand.u32 1, %s4042_s13  }
 0x4cc   : > { %s3284_s22 = scalar_lea.sflag [#allocation4], %s3283_s21 }
 0x4cd   : > { %p3815_p3 = pnand %p3818_p2, %p4171_p8 }
 0x4cf   : > { %4037 = dma.done.wait (!%p3815_p3), %s3284_s22, 8192  }
 0x4d0   : > { %4039 = vsyncadd (!%p3815_p3), %s3284_s22, 4294959104  ;;  %s23_s18 = sadd.s32 1, %s4062_s18   ;;  %s5400_s23 = sld [smem:[#allocation6_spill]] }
 0x4d1   : > { %p20_p5 = scmp.ge.s32.totalorder %s23_s18, 4   ;;  %s5401_s13 = smov %s4046_s14 }
 0x4d2   : > { %s5402_s14 = smov %s4050_s15  ;;  %s5403_s15 = smov %s4177_s26 }
 0x4d3   : > { %s5404_s16 = smov %s4058_s17  ;;  %22 = sbr.rel (!%p20_p5) target bundleno = 4 (0x4), region = 101 }
 0x4d6   : > { %s5405_s17 = smov %s5400_s23 }
 0x4da   :  { %3289 = vsyncpa [#allocation4], 1 }
 0x4db   :  { %3291 = vsyncpa [#allocation4 + $0x1], 1 }

</bundles_post_ra>
